<compile_context>
chip_gen: v7x
topology: tpu7x:2x2x1
jax: 0.10.0
libtpu: 0.0.40
codegen_flags: <defaults>
</compile_context>

<pallas_src>
import jax
import jax.numpy as jnp
from jax import lax
from jax.experimental import pallas as pl
from jax.experimental.pallas import tpu as pltpu

# ---------------- configuration (small, deterministic) ----------------
N_NODES = 16
N_EDGES = 48
IN_DIM = 32
OUT_DIM = 32
NUM_HEADS = 4
DH = OUT_DIM // NUM_HEADS
ATTN_CLAMP = 5.0
LN_EPS = 1e-5


def _layer_norm(v, w, b):
    mu = jnp.mean(v, axis=-1, keepdims=True)
    var = jnp.mean((v - mu) ** 2, axis=-1, keepdims=True)
    return (v - mu) * lax.rsqrt(var + LN_EPS) * w + b


# ---------------- single fused Pallas kernel ----------------
def grit_fused_kernel(
    # data
    x_ref, ea_ref, src_ref, dst_ref, logdeg_ref,
    # attention params
    wqkv_ref, bqkv_ref, we_w_ref, we_b_ref,
    aw_ref, ve_ref, expand_ref,
    # node-update params
    dc0_ref, dc1_ref,
    ohw_ref, ohb_ref, ln1hw_ref, ln1hb_ref,
    w1_ref, b1_ref, w2_ref, b2_ref, ln2hw_ref, ln2hb_ref,
    # edge-update params
    oew_ref, oeb_ref, ln1ew_ref, ln1eb_ref,
    # outputs
    hout_ref, eout_ref,
):
    D = OUT_DIM
    N = x_ref.shape[0]
    E = ea_ref.shape[0]
    f32 = jnp.float32

    # ---- fused projections: [Q|K|V] and [E_w|E_b] (columns pre-permuted) ----
    qkv = jnp.dot(x_ref[...], wqkv_ref[...], preferred_element_type=f32) + bqkv_ref[...]
    Qh = qkv[:, :D]
    KV = qkv[:, D:]                                        # [N, 2D] = [K | V]
    eproj = jnp.dot(ea_ref[...], we_w_ref[...], preferred_element_type=f32) + we_b_ref[...]
    Ew, Eb = eproj[:, :D], eproj[:, D:]

    # ---- in-kernel gathers as one-hot MXU matmuls ----
    src = src_ref[...]                                     # [E,1] int32
    dst = dst_ref[...]                                     # [E,1] int32
    col = lax.broadcasted_iota(jnp.int32, (E, N), 1)       # [E,N]
    oh_src = (col == src).astype(f32)                      # [E,N]
    oh_dst = (col == dst).astype(f32)                      # [E,N]
    kv_src = jnp.dot(oh_src, KV, preferred_element_type=f32)   # [E,2D] = [K_h[src] | V_h[src]]
    Ksrc, Vsrc = kv_src[:, :D], kv_src[:, D:]
    Qdst = jnp.dot(oh_dst, Qh, preferred_element_type=f32)     # Q_h[dst]

    # ---- edge score: (*E_w, signed-sqrt, +E_b, attn_act=relu) ----
    s = (Ksrc + Qdst) * Ew
    s = jnp.sqrt(jnp.maximum(s, 0.0) + 1e-8) - jnp.sqrt(jnp.maximum(-s, 0.0) + 1e-8)
    s = s + Eb
    s = jnp.maximum(s, 0.0)
    wE = s                                                 # e_t / wE (post-activation)

    # per-head Aw contraction as block-diagonal [E,D]@[D,H]; clamp to +/-5
    logit = jnp.dot(s, aw_ref[...], preferred_element_type=f32)       # [E,H]
    logit = jnp.clip(logit, -ATTN_CLAMP, ATTN_CLAMP)

    # ---- segment softmax over destination nodes (safe without max-sub:
    #      logits clamped to [-5, 5]) ----
    ex = jnp.exp(logit)                                               # [E,H]
    c_dims = (((0,), (0,)), ((), ()))                                 # contract over E
    denom = lax.dot_general(oh_dst, ex, c_dims, preferred_element_type=f32)   # [N,H]
    denom_e = jnp.dot(oh_dst, denom, preferred_element_type=f32)              # [E,H]
    attn = ex * pl.reciprocal(denom_e + 1e-16, approx=True)                   # EUP slot

    # ---- aggregation + edge-enhance (both scatter-sums fused into one dot) ----
    attn_full = jnp.dot(attn, expand_ref[...], preferred_element_type=f32)    # [E,D]
    msg = jnp.concatenate([Vsrc * attn_full, wE * attn_full], axis=1)         # [E,2D]
    agg = lax.dot_general(oh_dst, msg, c_dims, preferred_element_type=f32)    # [N,2D]
    wV, rowV = agg[:, :D], agg[:, D:]
    wV = wV + jnp.dot(rowV, ve_ref[...], preferred_element_type=f32)

    # ---- node update: deg scaler, O_h, residual, LN1, FFN, residual, LN2 ----
    h = wV * dc0_ref[...] + (wV * logdeg_ref[...]) * dc1_ref[...]
    h = jnp.dot(h, ohw_ref[...], preferred_element_type=f32) + ohb_ref[...]
    h = x_ref[...] + h
    h = _layer_norm(h, ln1hw_ref[...], ln1hb_ref[...])
    h2 = jnp.dot(h, w1_ref[...], preferred_element_type=f32) + b1_ref[...]
    h2 = jnp.maximum(h2, 0.0)
    h2 = jnp.dot(h2, w2_ref[...], preferred_element_type=f32) + b2_ref[...]
    hout_ref[...] = _layer_norm(h + h2, ln2hw_ref[...], ln2hb_ref[...])

    # ---- edge update: O_e, residual, LN1_e ----
    e = jnp.dot(wE, oew_ref[...], preferred_element_type=f32) + oeb_ref[...]
    e = e + ea_ref[...]
    eout_ref[...] = _layer_norm(e, ln1ew_ref[...], ln1eb_ref[...])


# ---------------- wrapper: one pallas_call, everything in VMEM ----------------
def _vmem_spec():
    return pl.BlockSpec(memory_space=pltpu.MemorySpace.VMEM)


@jax.jit
def grit_layer_forward(x, edge_attr, edge_index, log_deg, params):
    N = x.shape[0]
    E = edge_attr.shape[0]
    D = OUT_DIM
    src = edge_index[0].astype(jnp.int32).reshape(E, 1)
    dst = edge_index[1].astype(jnp.int32).reshape(E, 1)

    inputs = [
        x, edge_attr, src, dst, log_deg.reshape(N, 1).astype(jnp.float32),
        params["W_qkv"], params["b_qkv"], params["W_E"], params["b_E"],
        params["Aw_mat"], params["VeRow_mat"], params["expand"],
        params["dc0"], params["dc1"],
        params["Oh_W"], params["Oh_b"], params["ln1h_w"], params["ln1h_b"],
        params["W1"], params["b1"], params["W2"], params["b2"],
        params["ln2h_w"], params["ln2h_b"],
        params["Oe_W"], params["Oe_b"], params["ln1e_w"], params["ln1e_b"],
    ]
    out_shape = (
        jax.ShapeDtypeStruct((N, D), jnp.float32),
        jax.ShapeDtypeStruct((E, D), jnp.float32),
    )
    h_out, e_out = pl.pallas_call(
        grit_fused_kernel,
        in_specs=[_vmem_spec() for _ in inputs],
        out_specs=(_vmem_spec(), _vmem_spec()),
        out_shape=out_shape,
        compiler_params=pltpu.CompilerParams(vmem_limit_bytes=16 * 1024 * 1024),
    )(*inputs)
    return h_out, e_out


# ---------------- parameter construction (deterministic, synthetic) ----------------
def make_params(key):
    D, H, Dh = OUT_DIM, NUM_HEADS, DH
    ks = list(jax.random.split(key, 20))

    def xavier(k, shape, fan_in, fan_out):
        std = (2.0 / (fan_in + fan_out)) ** 0.5
        return std * jax.random.normal(k, shape, dtype=jnp.float32)

    p = {}
    # Q, K, V projections fused as one [in, 3D] matrix. K/V have no bias
    # (attn_use_bias=False), Q has bias.
    Wq = xavier(ks[0], (IN_DIM, D), IN_DIM, D)
    Wk = xavier(ks[1], (IN_DIM, D), IN_DIM, D)
    Wv = xavier(ks[2], (IN_DIM, D), IN_DIM, D)
    bq = 0.01 * jax.random.normal(ks[3], (1, D), dtype=jnp.float32)
    p["W_qkv"] = jnp.concatenate([Wq, Wk, Wv], axis=1)
    p["b_qkv"] = jnp.concatenate(
        [bq, jnp.zeros((1, D), jnp.float32), jnp.zeros((1, D), jnp.float32)], axis=1)

    # E projection [in, 2D]; permute columns so output is [E_w(flat) | E_b(flat)]
    # in head-major flat layout (pure re-parameterisation of storage).
    W_E = xavier(ks[4], (IN_DIM, 2 * D), IN_DIM, 2 * D)
    b_E = 0.01 * jax.random.normal(ks[5], (1, 2 * D), dtype=jnp.float32)
    ew_cols = jnp.array([h * 2 * Dh + d for h in range(H) for d in range(Dh)], jnp.int32)
    eb_cols = jnp.array([h * 2 * Dh + Dh + d for h in range(H) for d in range(Dh)], jnp.int32)
    perm = jnp.concatenate([ew_cols, eb_cols])
    p["W_E"] = W_E[:, perm]
    p["b_E"] = b_E[:, perm]

    # Aw [Dh, H, 1] -> block-diagonal [D, H]
    Aw = xavier(ks[6], (Dh, H, 1), Dh, H)
    A_mat = jnp.zeros((D, H), jnp.float32)
    for h in range(H):
        A_mat = A_mat.at[h * Dh:(h + 1) * Dh, h].set(Aw[:, h, 0])
    p["Aw_mat"] = A_mat

    # VeRow [Dh, H, Dh] -> block-diagonal [D, D]
    VeRow = xavier(ks[7], (Dh, H, Dh), Dh, Dh)
    Ve_mat = jnp.zeros((D, D), jnp.float32)
    for h in range(H):
        Ve_mat = Ve_mat.at[h * Dh:(h + 1) * Dh, h * Dh:(h + 1) * Dh].set(VeRow[:, h, :])
    p["VeRow_mat"] = Ve_mat

    # per-head attention expansion matrix [H, D]
    R = jnp.zeros((H, D), jnp.float32)
    for h in range(H):
        R = R.at[h, h * Dh:(h + 1) * Dh].set(1.0)
    p["expand"] = R

    # deg scaler coef [1, D, 2]
    dc = xavier(ks[8], (1, D, 2), D, 2)
    p["dc0"] = dc[:, :, 0]
    p["dc1"] = dc[:, :, 1]

    # O_h, O_e
    p["Oh_W"] = xavier(ks[9], (D, D), D, D)
    p["Oh_b"] = 0.01 * jax.random.normal(ks[10], (1, D), dtype=jnp.float32)
    p["Oe_W"] = xavier(ks[11], (D, D), D, D)
    p["Oe_b"] = 0.01 * jax.random.normal(ks[12], (1, D), dtype=jnp.float32)

    # FFN
    p["W1"] = xavier(ks[13], (D, 2 * D), D, 2 * D)
    p["b1"] = 0.01 * jax.random.normal(ks[14], (1, 2 * D), dtype=jnp.float32)
    p["W2"] = xavier(ks[15], (2 * D, D), 2 * D, D)
    p["b2"] = 0.01 * jax.random.normal(ks[16], (1, D), dtype=jnp.float32)

    # LayerNorms
    for name in ("ln1h", "ln1e", "ln2h"):
        p[f"{name}_w"] = jnp.ones((1, D), jnp.float32)
        p[f"{name}_b"] = jnp.zeros((1, D), jnp.float32)
    return p


# ---------------- pure-JAX reference (correctness check) ----------------
def reference_forward(x, edge_attr, edge_index, log_deg, params):
    D = OUT_DIM
    N = x.shape[0]
    src, dst = edge_index[0], edge_index[1]
    hp = lax.Precision.HIGHEST

    qkv = jnp.dot(x, params["W_qkv"], precision=hp) + params["b_qkv"]
    Qh, Kh, Vh = qkv[:, :D], qkv[:, D:2 * D], qkv[:, 2 * D:]
    eproj = jnp.dot(edge_attr, params["W_E"], precision=hp) + params["b_E"]
    Ew, Eb = eproj[:, :D], eproj[:, D:]

    s = (Kh[src] + Qh[dst]) * Ew
    s = jnp.sqrt(jax.nn.relu(s) + 1e-8) - jnp.sqrt(jax.nn.relu(-s) + 1e-8)
    s = jax.nn.relu(s + Eb)
    wE = s
    logit = jnp.clip(jnp.dot(s, params["Aw_mat"], precision=hp), -ATTN_CLAMP, ATTN_CLAMP)
    ex = jnp.exp(logit)
    denom = jax.ops.segment_sum(ex, dst, num_segments=N)
    attn = ex / (denom[dst] + 1e-16)
    attn_full = jnp.dot(attn, params["expand"], precision=hp)
    msg = Vh[src] * attn_full
    wV = jax.ops.segment_sum(msg, dst, num_segments=N)
    rowV = jax.ops.segment_sum(wE * attn_full, dst, num_segments=N)
    wV = wV + jnp.dot(rowV, params["VeRow_mat"], precision=hp)

    h = wV * params["dc0"] + (wV * log_deg.reshape(N, 1)) * params["dc1"]
    h = jnp.dot(h, params["Oh_W"], precision=hp) + params["Oh_b"]
    h = x + h
    h = _layer_norm(h, params["ln1h_w"], params["ln1h_b"])
    h2 = jax.nn.relu(jnp.dot(h, params["W1"], precision=hp) + params["b1"])
    h2 = jnp.dot(h2, params["W2"], precision=hp) + params["b2"]
    h = _layer_norm(h + h2, params["ln2h_w"], params["ln2h_b"])

    e = jnp.dot(wE, params["Oe_W"], precision=hp) + params["Oe_b"]
    e = _layer_norm(e + edge_attr, params["ln1e_w"], params["ln1e_b"])
    return h, e


# ---------------- main ----------------
if __name__ == "__main__":
    key = jax.random.PRNGKey(0)
    k_x, k_e, k_s, k_d, k_p = jax.random.split(key, 5)

    x = jax.random.normal(k_x, (N_NODES, IN_DIM), dtype=jnp.float32)
    edge_attr = jax.random.normal(k_e, (N_EDGES, IN_DIM), dtype=jnp.float32)
    src = jax.random.randint(k_s, (N_EDGES,), 0, N_NODES)
    dst = jax.random.randint(k_d, (N_EDGES,), 0, N_NODES)
    edge_index = jnp.stack([src, dst], axis=0)
    deg = jnp.zeros((N_NODES,), jnp.float32).at[dst].add(1.0)
    log_deg = jnp.log(deg + 1.0)

    params = make_params(k_p)

    h_out, e_out = grit_layer_forward(x, edge_attr, edge_index, log_deg, params)
    jax.block_until_ready((h_out, e_out))

    assert h_out.shape == (N_NODES, OUT_DIM)
    assert e_out.shape == (N_EDGES, OUT_DIM)
    assert bool(jnp.all(jnp.isfinite(h_out))) and bool(jnp.all(jnp.isfinite(e_out)))

    # correctness check vs pure-JAX reference (tolerance covers approx reciprocal)
    h_ref, e_ref = reference_forward(x, edge_attr, edge_index, log_deg, params)
    assert bool(jnp.allclose(h_out, h_ref, atol=3e-2, rtol=3e-2))
    assert bool(jnp.allclose(e_out, e_ref, atol=3e-2, rtol=3e-2))

    print("KERNEL_OK")
</pallas_src>

<mosaic_0001>
module attributes {stable_mosaic.version = 11 : i64} {
  func.func @grit_fused_kernel(%arg0: memref<16x32xf32, #tpu.memory_space<vmem>>, %arg1: memref<48x32xf32, #tpu.memory_space<vmem>>, %arg2: memref<48x1xi32, #tpu.memory_space<vmem>>, %arg3: memref<48x1xi32, #tpu.memory_space<vmem>>, %arg4: memref<16x1xf32, #tpu.memory_space<vmem>>, %arg5: memref<32x96xf32, #tpu.memory_space<vmem>>, %arg6: memref<1x96xf32, #tpu.memory_space<vmem>>, %arg7: memref<32x64xf32, #tpu.memory_space<vmem>>, %arg8: memref<1x64xf32, #tpu.memory_space<vmem>>, %arg9: memref<32x4xf32, #tpu.memory_space<vmem>>, %arg10: memref<32x32xf32, #tpu.memory_space<vmem>>, %arg11: memref<4x32xf32, #tpu.memory_space<vmem>>, %arg12: memref<1x32xf32, #tpu.memory_space<vmem>>, %arg13: memref<1x32xf32, #tpu.memory_space<vmem>>, %arg14: memref<32x32xf32, #tpu.memory_space<vmem>>, %arg15: memref<1x32xf32, #tpu.memory_space<vmem>>, %arg16: memref<1x32xf32, #tpu.memory_space<vmem>>, %arg17: memref<1x32xf32, #tpu.memory_space<vmem>>, %arg18: memref<32x64xf32, #tpu.memory_space<vmem>>, %arg19: memref<1x64xf32, #tpu.memory_space<vmem>>, %arg20: memref<64x32xf32, #tpu.memory_space<vmem>>, %arg21: memref<1x32xf32, #tpu.memory_space<vmem>>, %arg22: memref<1x32xf32, #tpu.memory_space<vmem>>, %arg23: memref<1x32xf32, #tpu.memory_space<vmem>>, %arg24: memref<32x32xf32, #tpu.memory_space<vmem>>, %arg25: memref<1x32xf32, #tpu.memory_space<vmem>>, %arg26: memref<1x32xf32, #tpu.memory_space<vmem>>, %arg27: memref<1x32xf32, #tpu.memory_space<vmem>>, %arg28: memref<16x32xf32, #tpu.memory_space<vmem>>, %arg29: memref<48x32xf32, #tpu.memory_space<vmem>>) attributes {dimension_semantics = [], scalar_prefetch = 0 : i64, scratch_operands = 0 : i64, tpu.core_type = #tpu.core_type<tc>} {
    %c0 = arith.constant 0 : index
    %c0_0 = arith.constant 0 : index
    %0 = vector.load %arg0[%c0, %c0_0] : memref<16x32xf32, #tpu.memory_space<vmem>>, vector<16x32xf32>
    %c0_1 = arith.constant 0 : index
    %c0_2 = arith.constant 0 : index
    %1 = vector.load %arg5[%c0_1, %c0_2] : memref<32x96xf32, #tpu.memory_space<vmem>>, vector<32x96xf32>
    %cst = arith.constant dense<0.000000e+00> : vector<16x96xf32>
    %2 = tpu.matmul %0, %1, %cst {dimension_numbers = #tpu.dot_dimension_numbers<[1], [0], [0], [1], [0, 0, 1, 1], [], []>} : vector<16x32xf32>, vector<32x96xf32>, vector<16x96xf32> -> vector<16x96xf32>
    %c0_3 = arith.constant 0 : index
    %c0_4 = arith.constant 0 : index
    %3 = vector.load %arg6[%c0_3, %c0_4] : memref<1x96xf32, #tpu.memory_space<vmem>>, vector<1x96xf32>
    %4 = vector.broadcast %3 : vector<1x96xf32> to vector<16x96xf32>
    %5 = arith.addf %2, %4 : vector<16x96xf32>
    %6 = vector.extract_strided_slice %5 {offsets = [0, 0], sizes = [16, 32], strides = [1, 1]} : vector<16x96xf32> to vector<16x32xf32>
    %7 = vector.extract_strided_slice %5 {offsets = [0, 32], sizes = [16, 64], strides = [1, 1]} : vector<16x96xf32> to vector<16x64xf32>
    %c0_5 = arith.constant 0 : index
    %c0_6 = arith.constant 0 : index
    %8 = vector.load %arg1[%c0_5, %c0_6] : memref<48x32xf32, #tpu.memory_space<vmem>>, vector<48x32xf32>
    %c0_7 = arith.constant 0 : index
    %c0_8 = arith.constant 0 : index
    %9 = vector.load %arg7[%c0_7, %c0_8] : memref<32x64xf32, #tpu.memory_space<vmem>>, vector<32x64xf32>
    %cst_9 = arith.constant dense<0.000000e+00> : vector<48x64xf32>
    %10 = tpu.matmul %8, %9, %cst_9 {dimension_numbers = #tpu.dot_dimension_numbers<[1], [0], [0], [1], [0, 0, 1, 1], [], []>} : vector<48x32xf32>, vector<32x64xf32>, vector<48x64xf32> -> vector<48x64xf32>
    %c0_10 = arith.constant 0 : index
    %c0_11 = arith.constant 0 : index
    %11 = vector.load %arg8[%c0_10, %c0_11] : memref<1x64xf32, #tpu.memory_space<vmem>>, vector<1x64xf32>
    %12 = vector.broadcast %11 : vector<1x64xf32> to vector<48x64xf32>
    %13 = arith.addf %10, %12 : vector<48x64xf32>
    %14 = vector.extract_strided_slice %13 {offsets = [0, 0], sizes = [48, 32], strides = [1, 1]} : vector<48x64xf32> to vector<48x32xf32>
    %15 = vector.extract_strided_slice %13 {offsets = [0, 32], sizes = [48, 32], strides = [1, 1]} : vector<48x64xf32> to vector<48x32xf32>
    %c0_12 = arith.constant 0 : index
    %c0_13 = arith.constant 0 : index
    %16 = vector.load %arg2[%c0_12, %c0_13] : memref<48x1xi32, #tpu.memory_space<vmem>>, vector<48x1xi32>
    %c0_14 = arith.constant 0 : index
    %c0_15 = arith.constant 0 : index
    %17 = vector.load %arg3[%c0_14, %c0_15] : memref<48x1xi32, #tpu.memory_space<vmem>>, vector<48x1xi32>
    %18 = tpu.iota {dimensions = array<i32: 1>} : vector<48x16xi32>
    %19 = vector.broadcast %16 : vector<48x1xi32> to vector<48x16xi32>
    %20 = arith.cmpi eq, %18, %19 : vector<48x16xi32>
    %21 = arith.extui %20 : vector<48x16xi1> to vector<48x16xi32>
    %22 = arith.sitofp %21 : vector<48x16xi32> to vector<48x16xf32>
    %23 = vector.broadcast %17 : vector<48x1xi32> to vector<48x16xi32>
    %24 = arith.cmpi eq, %18, %23 : vector<48x16xi32>
    %25 = arith.extui %24 : vector<48x16xi1> to vector<48x16xi32>
    %26 = arith.sitofp %25 : vector<48x16xi32> to vector<48x16xf32>
    %cst_16 = arith.constant dense<0.000000e+00> : vector<48x64xf32>
    %27 = tpu.matmul %22, %7, %cst_16 {dimension_numbers = #tpu.dot_dimension_numbers<[1], [0], [0], [1], [0, 0, 1, 1], [], []>} : vector<48x16xf32>, vector<16x64xf32>, vector<48x64xf32> -> vector<48x64xf32>
    %28 = vector.extract_strided_slice %27 {offsets = [0, 0], sizes = [48, 32], strides = [1, 1]} : vector<48x64xf32> to vector<48x32xf32>
    %29 = vector.extract_strided_slice %27 {offsets = [0, 32], sizes = [48, 32], strides = [1, 1]} : vector<48x64xf32> to vector<48x32xf32>
    %cst_17 = arith.constant dense<0.000000e+00> : vector<48x32xf32>
    %30 = tpu.matmul %26, %6, %cst_17 {dimension_numbers = #tpu.dot_dimension_numbers<[1], [0], [0], [1], [0, 0, 1, 1], [], []>} : vector<48x16xf32>, vector<16x32xf32>, vector<48x32xf32> -> vector<48x32xf32>
    %31 = arith.addf %28, %30 : vector<48x32xf32>
    %32 = arith.mulf %31, %14 : vector<48x32xf32>
    %cst_18 = arith.constant 0.000000e+00 : f32
    %33 = vector.broadcast %cst_18 : f32 to vector<48x32xf32>
    %34 = arith.maximumf %32, %33 : vector<48x32xf32>
    %cst_19 = arith.constant 9.99999993E-9 : f32
    %35 = vector.broadcast %cst_19 : f32 to vector<48x32xf32>
    %36 = arith.addf %34, %35 : vector<48x32xf32>
    %37 = math.sqrt %36 : vector<48x32xf32>
    %cst_20 = arith.constant 0.000000e+00 : f32
    %38 = vector.broadcast %cst_20 : f32 to vector<48x32xf32>
    %39 = arith.subf %38, %32 : vector<48x32xf32>
    %cst_21 = arith.constant 0.000000e+00 : f32
    %40 = vector.broadcast %cst_21 : f32 to vector<48x32xf32>
    %41 = arith.maximumf %39, %40 : vector<48x32xf32>
    %cst_22 = arith.constant 9.99999993E-9 : f32
    %42 = vector.broadcast %cst_22 : f32 to vector<48x32xf32>
    %43 = arith.addf %41, %42 : vector<48x32xf32>
    %44 = math.sqrt %43 : vector<48x32xf32>
    %45 = arith.subf %37, %44 : vector<48x32xf32>
    %46 = arith.addf %45, %15 : vector<48x32xf32>
    %cst_23 = arith.constant 0.000000e+00 : f32
    %47 = vector.broadcast %cst_23 : f32 to vector<48x32xf32>
    %48 = arith.maximumf %46, %47 : vector<48x32xf32>
    %c0_24 = arith.constant 0 : index
    %c0_25 = arith.constant 0 : index
    %49 = vector.load %arg9[%c0_24, %c0_25] : memref<32x4xf32, #tpu.memory_space<vmem>>, vector<32x4xf32>
    %cst_26 = arith.constant dense<0.000000e+00> : vector<48x4xf32>
    %50 = tpu.matmul %48, %49, %cst_26 {dimension_numbers = #tpu.dot_dimension_numbers<[1], [0], [0], [1], [0, 0, 1, 1], [], []>} : vector<48x32xf32>, vector<32x4xf32>, vector<48x4xf32> -> vector<48x4xf32>
    %cst_27 = arith.constant -5.000000e+00 : f32
    %cst_28 = arith.constant 5.000000e+00 : f32
    %51 = vector.broadcast %cst_27 : f32 to vector<48x4xf32>
    %52 = arith.maximumf %51, %50 : vector<48x4xf32>
    %53 = vector.broadcast %cst_28 : f32 to vector<48x4xf32>
    %54 = arith.minimumf %53, %52 : vector<48x4xf32>
    %55 = math.exp %54 : vector<48x4xf32>
    %cst_29 = arith.constant dense<0.000000e+00> : vector<16x4xf32>
    %56 = tpu.matmul %26, %55, %cst_29 {dimension_numbers = #tpu.dot_dimension_numbers<[0], [0], [1], [1], [0, 1, 1, 1], [], []>} : vector<48x16xf32>, vector<48x4xf32>, vector<16x4xf32> -> vector<16x4xf32>
    %cst_30 = arith.constant dense<0.000000e+00> : vector<48x4xf32>
    %57 = tpu.matmul %26, %56, %cst_30 {dimension_numbers = #tpu.dot_dimension_numbers<[1], [0], [0], [1], [0, 0, 1, 1], [], []>} : vector<48x16xf32>, vector<16x4xf32>, vector<48x4xf32> -> vector<48x4xf32>
    %cst_31 = arith.constant 1.000000e-16 : f32
    %58 = vector.broadcast %cst_31 : f32 to vector<48x4xf32>
    %59 = arith.addf %57, %58 : vector<48x4xf32>
    %60 = tpu.reciprocal %59 {approx = true} : vector<48x4xf32> -> vector<48x4xf32>
    %61 = arith.mulf %55, %60 : vector<48x4xf32>
    %c0_32 = arith.constant 0 : index
    %c0_33 = arith.constant 0 : index
    %62 = vector.load %arg11[%c0_32, %c0_33] : memref<4x32xf32, #tpu.memory_space<vmem>>, vector<4x32xf32>
    %cst_34 = arith.constant dense<0.000000e+00> : vector<48x32xf32>
    %63 = tpu.matmul %61, %62, %cst_34 {dimension_numbers = #tpu.dot_dimension_numbers<[1], [0], [0], [1], [0, 0, 1, 1], [], []>} : vector<48x4xf32>, vector<4x32xf32>, vector<48x32xf32> -> vector<48x32xf32>
    %64 = arith.mulf %29, %63 : vector<48x32xf32>
    %65 = arith.mulf %48, %63 : vector<48x32xf32>
    %66 = tpu.concatenate %64, %65 in 1 : vector<48x32xf32>, vector<48x32xf32> -> vector<48x64xf32>
    %cst_35 = arith.constant dense<0.000000e+00> : vector<16x64xf32>
    %67 = tpu.matmul %26, %66, %cst_35 {dimension_numbers = #tpu.dot_dimension_numbers<[0], [0], [1], [1], [0, 1, 1, 1], [], []>} : vector<48x16xf32>, vector<48x64xf32>, vector<16x64xf32> -> vector<16x64xf32>
    %68 = vector.extract_strided_slice %67 {offsets = [0, 0], sizes = [16, 32], strides = [1, 1]} : vector<16x64xf32> to vector<16x32xf32>
    %69 = vector.extract_strided_slice %67 {offsets = [0, 32], sizes = [16, 32], strides = [1, 1]} : vector<16x64xf32> to vector<16x32xf32>
    %c0_36 = arith.constant 0 : index
    %c0_37 = arith.constant 0 : index
    %70 = vector.load %arg10[%c0_36, %c0_37] : memref<32x32xf32, #tpu.memory_space<vmem>>, vector<32x32xf32>
    %cst_38 = arith.constant dense<0.000000e+00> : vector<16x32xf32>
    %71 = tpu.matmul %69, %70, %cst_38 {dimension_numbers = #tpu.dot_dimension_numbers<[1], [0], [0], [1], [0, 0, 1, 1], [], []>} : vector<16x32xf32>, vector<32x32xf32>, vector<16x32xf32> -> vector<16x32xf32>
    %72 = arith.addf %68, %71 : vector<16x32xf32>
    %c0_39 = arith.constant 0 : index
    %c0_40 = arith.constant 0 : index
    %73 = vector.load %arg12[%c0_39, %c0_40] : memref<1x32xf32, #tpu.memory_space<vmem>>, vector<1x32xf32>
    %74 = vector.broadcast %73 : vector<1x32xf32> to vector<16x32xf32>
    %75 = arith.mulf %72, %74 : vector<16x32xf32>
    %c0_41 = arith.constant 0 : index
    %c0_42 = arith.constant 0 : index
    %76 = vector.load %arg4[%c0_41, %c0_42] : memref<16x1xf32, #tpu.memory_space<vmem>>, vector<16x1xf32>
    %77 = vector.broadcast %76 : vector<16x1xf32> to vector<16x32xf32>
    %78 = arith.mulf %72, %77 : vector<16x32xf32>
    %c0_43 = arith.constant 0 : index
    %c0_44 = arith.constant 0 : index
    %79 = vector.load %arg13[%c0_43, %c0_44] : memref<1x32xf32, #tpu.memory_space<vmem>>, vector<1x32xf32>
    %80 = vector.broadcast %79 : vector<1x32xf32> to vector<16x32xf32>
    %81 = arith.mulf %78, %80 : vector<16x32xf32>
    %82 = arith.addf %75, %81 : vector<16x32xf32>
    %c0_45 = arith.constant 0 : index
    %c0_46 = arith.constant 0 : index
    %83 = vector.load %arg14[%c0_45, %c0_46] : memref<32x32xf32, #tpu.memory_space<vmem>>, vector<32x32xf32>
    %cst_47 = arith.constant dense<0.000000e+00> : vector<16x32xf32>
    %84 = tpu.matmul %82, %83, %cst_47 {dimension_numbers = #tpu.dot_dimension_numbers<[1], [0], [0], [1], [0, 0, 1, 1], [], []>} : vector<16x32xf32>, vector<32x32xf32>, vector<16x32xf32> -> vector<16x32xf32>
    %c0_48 = arith.constant 0 : index
    %c0_49 = arith.constant 0 : index
    %85 = vector.load %arg15[%c0_48, %c0_49] : memref<1x32xf32, #tpu.memory_space<vmem>>, vector<1x32xf32>
    %86 = vector.broadcast %85 : vector<1x32xf32> to vector<16x32xf32>
    %87 = arith.addf %84, %86 : vector<16x32xf32>
    %c0_50 = arith.constant 0 : index
    %c0_51 = arith.constant 0 : index
    %88 = vector.load %arg0[%c0_50, %c0_51] : memref<16x32xf32, #tpu.memory_space<vmem>>, vector<16x32xf32>
    %89 = arith.addf %88, %87 : vector<16x32xf32>
    %c0_52 = arith.constant 0 : index
    %c0_53 = arith.constant 0 : index
    %90 = vector.load %arg16[%c0_52, %c0_53] : memref<1x32xf32, #tpu.memory_space<vmem>>, vector<1x32xf32>
    %c0_54 = arith.constant 0 : index
    %c0_55 = arith.constant 0 : index
    %91 = vector.load %arg17[%c0_54, %c0_55] : memref<1x32xf32, #tpu.memory_space<vmem>>, vector<1x32xf32>
    %cst_56 = arith.constant dense<0.000000e+00> : vector<16xf32>
    %92 = vector.multi_reduction <add>, %89, %cst_56 [1] : vector<16x32xf32> to vector<16xf32>
    %93 = vector.shape_cast %92 : vector<16xf32> to vector<16x1xf32>
    %cst_57 = arith.constant 3.200000e+01 : f32
    %94 = vector.broadcast %cst_57 : f32 to vector<16x1xf32>
    %95 = arith.divf %93, %94 : vector<16x1xf32>
    %96 = vector.broadcast %95 : vector<16x1xf32> to vector<16x32xf32>
    %97 = arith.subf %89, %96 : vector<16x32xf32>
    %98 = arith.mulf %97, %97 : vector<16x32xf32>
    %cst_58 = arith.constant dense<0.000000e+00> : vector<16xf32>
    %99 = vector.multi_reduction <add>, %98, %cst_58 [1] : vector<16x32xf32> to vector<16xf32>
    %100 = vector.shape_cast %99 : vector<16xf32> to vector<16x1xf32>
    %cst_59 = arith.constant 3.200000e+01 : f32
    %101 = vector.broadcast %cst_59 : f32 to vector<16x1xf32>
    %102 = arith.divf %100, %101 : vector<16x1xf32>
    %103 = vector.broadcast %95 : vector<16x1xf32> to vector<16x32xf32>
    %104 = arith.subf %89, %103 : vector<16x32xf32>
    %cst_60 = arith.constant 9.99999974E-6 : f32
    %105 = vector.broadcast %cst_60 : f32 to vector<16x1xf32>
    %106 = arith.addf %102, %105 : vector<16x1xf32>
    %107 = math.rsqrt %106 : vector<16x1xf32>
    %108 = vector.broadcast %107 : vector<16x1xf32> to vector<16x32xf32>
    %109 = arith.mulf %104, %108 : vector<16x32xf32>
    %110 = vector.broadcast %90 : vector<1x32xf32> to vector<16x32xf32>
    %111 = arith.mulf %109, %110 : vector<16x32xf32>
    %112 = vector.broadcast %91 : vector<1x32xf32> to vector<16x32xf32>
    %113 = arith.addf %111, %112 : vector<16x32xf32>
    %c0_61 = arith.constant 0 : index
    %c0_62 = arith.constant 0 : index
    %114 = vector.load %arg18[%c0_61, %c0_62] : memref<32x64xf32, #tpu.memory_space<vmem>>, vector<32x64xf32>
    %cst_63 = arith.constant dense<0.000000e+00> : vector<16x64xf32>
    %115 = tpu.matmul %113, %114, %cst_63 {dimension_numbers = #tpu.dot_dimension_numbers<[1], [0], [0], [1], [0, 0, 1, 1], [], []>} : vector<16x32xf32>, vector<32x64xf32>, vector<16x64xf32> -> vector<16x64xf32>
    %c0_64 = arith.constant 0 : index
    %c0_65 = arith.constant 0 : index
    %116 = vector.load %arg19[%c0_64, %c0_65] : memref<1x64xf32, #tpu.memory_space<vmem>>, vector<1x64xf32>
    %117 = vector.broadcast %116 : vector<1x64xf32> to vector<16x64xf32>
    %118 = arith.addf %115, %117 : vector<16x64xf32>
    %cst_66 = arith.constant 0.000000e+00 : f32
    %119 = vector.broadcast %cst_66 : f32 to vector<16x64xf32>
    %120 = arith.maximumf %118, %119 : vector<16x64xf32>
    %c0_67 = arith.constant 0 : index
    %c0_68 = arith.constant 0 : index
    %121 = vector.load %arg20[%c0_67, %c0_68] : memref<64x32xf32, #tpu.memory_space<vmem>>, vector<64x32xf32>
    %cst_69 = arith.constant dense<0.000000e+00> : vector<16x32xf32>
    %122 = tpu.matmul %120, %121, %cst_69 {dimension_numbers = #tpu.dot_dimension_numbers<[1], [0], [0], [1], [0, 0, 1, 1], [], []>} : vector<16x64xf32>, vector<64x32xf32>, vector<16x32xf32> -> vector<16x32xf32>
    %c0_70 = arith.constant 0 : index
    %c0_71 = arith.constant 0 : index
    %123 = vector.load %arg21[%c0_70, %c0_71] : memref<1x32xf32, #tpu.memory_space<vmem>>, vector<1x32xf32>
    %124 = vector.broadcast %123 : vector<1x32xf32> to vector<16x32xf32>
    %125 = arith.addf %122, %124 : vector<16x32xf32>
    %126 = arith.addf %113, %125 : vector<16x32xf32>
    %c0_72 = arith.constant 0 : index
    %c0_73 = arith.constant 0 : index
    %127 = vector.load %arg22[%c0_72, %c0_73] : memref<1x32xf32, #tpu.memory_space<vmem>>, vector<1x32xf32>
    %c0_74 = arith.constant 0 : index
    %c0_75 = arith.constant 0 : index
    %128 = vector.load %arg23[%c0_74, %c0_75] : memref<1x32xf32, #tpu.memory_space<vmem>>, vector<1x32xf32>
    %cst_76 = arith.constant dense<0.000000e+00> : vector<16xf32>
    %129 = vector.multi_reduction <add>, %126, %cst_76 [1] : vector<16x32xf32> to vector<16xf32>
    %130 = vector.shape_cast %129 : vector<16xf32> to vector<16x1xf32>
    %cst_77 = arith.constant 3.200000e+01 : f32
    %131 = vector.broadcast %cst_77 : f32 to vector<16x1xf32>
    %132 = arith.divf %130, %131 : vector<16x1xf32>
    %133 = vector.broadcast %132 : vector<16x1xf32> to vector<16x32xf32>
    %134 = arith.subf %126, %133 : vector<16x32xf32>
    %135 = arith.mulf %134, %134 : vector<16x32xf32>
    %cst_78 = arith.constant dense<0.000000e+00> : vector<16xf32>
    %136 = vector.multi_reduction <add>, %135, %cst_78 [1] : vector<16x32xf32> to vector<16xf32>
    %137 = vector.shape_cast %136 : vector<16xf32> to vector<16x1xf32>
    %cst_79 = arith.constant 3.200000e+01 : f32
    %138 = vector.broadcast %cst_79 : f32 to vector<16x1xf32>
    %139 = arith.divf %137, %138 : vector<16x1xf32>
    %140 = vector.broadcast %132 : vector<16x1xf32> to vector<16x32xf32>
    %141 = arith.subf %126, %140 : vector<16x32xf32>
    %cst_80 = arith.constant 9.99999974E-6 : f32
    %142 = vector.broadcast %cst_80 : f32 to vector<16x1xf32>
    %143 = arith.addf %139, %142 : vector<16x1xf32>
    %144 = math.rsqrt %143 : vector<16x1xf32>
    %145 = vector.broadcast %144 : vector<16x1xf32> to vector<16x32xf32>
    %146 = arith.mulf %141, %145 : vector<16x32xf32>
    %147 = vector.broadcast %127 : vector<1x32xf32> to vector<16x32xf32>
    %148 = arith.mulf %146, %147 : vector<16x32xf32>
    %149 = vector.broadcast %128 : vector<1x32xf32> to vector<16x32xf32>
    %150 = arith.addf %148, %149 : vector<16x32xf32>
    %c0_81 = arith.constant 0 : index
    %c0_82 = arith.constant 0 : index
    %151 = vector.load %arg28[%c0_81, %c0_82] : memref<16x32xf32, #tpu.memory_space<vmem>>, vector<16x32xf32>
    tpu.vector_store %arg28[%c0_81, %c0_82], %150 {strides = array<i32>} : memref<16x32xf32, #tpu.memory_space<vmem>>, vector<16x32xf32>,
    %c0_83 = arith.constant 0 : index
    %c0_84 = arith.constant 0 : index
    %152 = vector.load %arg24[%c0_83, %c0_84] : memref<32x32xf32, #tpu.memory_space<vmem>>, vector<32x32xf32>
    %cst_85 = arith.constant dense<0.000000e+00> : vector<48x32xf32>
    %153 = tpu.matmul %48, %152, %cst_85 {dimension_numbers = #tpu.dot_dimension_numbers<[1], [0], [0], [1], [0, 0, 1, 1], [], []>} : vector<48x32xf32>, vector<32x32xf32>, vector<48x32xf32> -> vector<48x32xf32>
    %c0_86 = arith.constant 0 : index
    %c0_87 = arith.constant 0 : index
    %154 = vector.load %arg25[%c0_86, %c0_87] : memref<1x32xf32, #tpu.memory_space<vmem>>, vector<1x32xf32>
    %155 = vector.broadcast %154 : vector<1x32xf32> to vector<48x32xf32>
    %156 = arith.addf %153, %155 : vector<48x32xf32>
    %c0_88 = arith.constant 0 : index
    %c0_89 = arith.constant 0 : index
    %157 = vector.load %arg1[%c0_88, %c0_89] : memref<48x32xf32, #tpu.memory_space<vmem>>, vector<48x32xf32>
    %158 = arith.addf %156, %157 : vector<48x32xf32>
    %c0_90 = arith.constant 0 : index
    %c0_91 = arith.constant 0 : index
    %159 = vector.load %arg26[%c0_90, %c0_91] : memref<1x32xf32, #tpu.memory_space<vmem>>, vector<1x32xf32>
    %c0_92 = arith.constant 0 : index
    %c0_93 = arith.constant 0 : index
    %160 = vector.load %arg27[%c0_92, %c0_93] : memref<1x32xf32, #tpu.memory_space<vmem>>, vector<1x32xf32>
    %cst_94 = arith.constant dense<0.000000e+00> : vector<48xf32>
    %161 = vector.multi_reduction <add>, %158, %cst_94 [1] : vector<48x32xf32> to vector<48xf32>
    %162 = vector.shape_cast %161 : vector<48xf32> to vector<48x1xf32>
    %cst_95 = arith.constant 3.200000e+01 : f32
    %163 = vector.broadcast %cst_95 : f32 to vector<48x1xf32>
    %164 = arith.divf %162, %163 : vector<48x1xf32>
    %165 = vector.broadcast %164 : vector<48x1xf32> to vector<48x32xf32>
    %166 = arith.subf %158, %165 : vector<48x32xf32>
    %167 = arith.mulf %166, %166 : vector<48x32xf32>
    %cst_96 = arith.constant dense<0.000000e+00> : vector<48xf32>
    %168 = vector.multi_reduction <add>, %167, %cst_96 [1] : vector<48x32xf32> to vector<48xf32>
    %169 = vector.shape_cast %168 : vector<48xf32> to vector<48x1xf32>
    %cst_97 = arith.constant 3.200000e+01 : f32
    %170 = vector.broadcast %cst_97 : f32 to vector<48x1xf32>
    %171 = arith.divf %169, %170 : vector<48x1xf32>
    %172 = vector.broadcast %164 : vector<48x1xf32> to vector<48x32xf32>
    %173 = arith.subf %158, %172 : vector<48x32xf32>
    %cst_98 = arith.constant 9.99999974E-6 : f32
    %174 = vector.broadcast %cst_98 : f32 to vector<48x1xf32>
    %175 = arith.addf %171, %174 : vector<48x1xf32>
    %176 = math.rsqrt %175 : vector<48x1xf32>
    %177 = vector.broadcast %176 : vector<48x1xf32> to vector<48x32xf32>
    %178 = arith.mulf %173, %177 : vector<48x32xf32>
    %179 = vector.broadcast %159 : vector<1x32xf32> to vector<48x32xf32>
    %180 = arith.mulf %178, %179 : vector<48x32xf32>
    %181 = vector.broadcast %160 : vector<1x32xf32> to vector<48x32xf32>
    %182 = arith.addf %180, %181 : vector<48x32xf32>
    %c0_99 = arith.constant 0 : index
    %c0_100 = arith.constant 0 : index
    %183 = vector.load %arg29[%c0_99, %c0_100] : memref<48x32xf32, #tpu.memory_space<vmem>>, vector<48x32xf32>
    tpu.vector_store %arg29[%c0_99, %c0_100], %182 {strides = array<i32>} : memref<48x32xf32, #tpu.memory_space<vmem>>, vector<48x32xf32>,
    return
  }
}

</mosaic_0001>

<bundles_post_ra>
// kernel: grit_layer_forward.1
= control target key start
LH: loop header
LB: loop body
LE: loop exit
PB: predicated region body
PF: predicated region fallthrough
CT: control target
= control target key end

     0   :  { %s2931_s6 = smov 1   ;;  %s2932_s10 = smov 2   ;;  %s3629_s0 = inlined_call_operand.smem [shape: u32[30], index: -1, kind: input, shape index: {}] }
   0x1   :  { %s2975_s5 = sld [smem:[%s3629_s0]]   ;;  %s2933_s14 = smov 3  }
   0x2   :  { %s2980_s9 = sld [smem:[%s3629_s0 + %s2931_s6]]   ;;  %s2934_s18 = smov 4  }
   0x3   :  { %s2985_s13 = sld [smem:[%s3629_s0 + %s2932_s10]]   ;;  %s2935_s22 = smov 5  }
   0x4   :  { %s2990_s17 = sld [smem:[%s3629_s0 + %s2933_s14]]   ;;  %s2936_s26 = smov 6  }
   0x5   :  { %s2995_s21 = sld [smem:[%s3629_s0 + %s2934_s18]]   ;;  %s2937_s30 = smov 7  }
   0x6   :  { %s3000_s25 = sld [smem:[%s3629_s0 + %s2935_s22]]   ;;  %s2938_s4 = smov 8  }
   0x7   :  { %s3005_s29 = sld [smem:[%s3629_s0 + %s2936_s26]]   ;;  %s2939_s10 = smov 9  }
   0x8   :  { %s3010_s3 = sld [smem:[%s3629_s0 + %s2937_s30]]   ;;  %s2940_s15 = smov 10  }
   0x9   :  { %s3015_s8 = sld [smem:[%s3629_s0 + %s2938_s4]]   ;;  %s2941_s20 = smov 11  }
   0xa   :  { %s3020_s14 = sld [smem:[%s3629_s0 + %s2939_s10]]   ;;  %s2942_s26 = smov 12  }
   0xb   :  { %s3025_s19 = sld [smem:[%s3629_s0 + %s2940_s15]]   ;;  %s2943_s1 = smov 13  }
   0xc   :  { %s3030_s24 = sld [smem:[%s3629_s0 + %s2941_s20]]   ;;  %s2944_s7 = smov 14  }
   0xd   :  { %s3035_s30 = sld [smem:[%s3629_s0 + %s2942_s26]]   ;;  %s2945_s15 = smov 15  }
   0xe   :  { %s3040_s6 = sld [smem:[%s3629_s0 + %s2943_s1]]   ;;  %s2946_s22 = smov 16  }
   0xf   :  { %s3045_s12 = sld [smem:[%s3629_s0 + %s2944_s7]]   ;;  %s2947_s28 = smov 17  }
  0x10   :  { %s3050_s20 = sld [smem:[%s3629_s0 + %s2945_s15]]   ;;  %s2948_s7 = smov 18  }
  0x11   :  { %s3055_s27 = sld [smem:[%s3629_s0 + %s2946_s22]]   ;;  %s2949_s15 = smov 19  }
  0x12   :  { %s3060_s4 = sld [smem:[%s3629_s0 + %s2947_s28]]   ;;  %s2950_s22 = smov 20  }
  0x13   :  { %3633 = sst [smem:[#allocation5_spill]] %s3035_s30  ;;  %s2951_s28 = smov 21  }
  0x14   :  { %s3065_s30 = sld [smem:[%s3629_s0 + %s2948_s7]]   ;;  %s2952_s7 = smov 22  }
  0x16   :  { %3634 = sst [smem:[#allocation6_spill]] %s3050_s20 }
  0x17   :  { %3635 = sst [smem:[#allocation7_spill]] %s3055_s27 }
  0x18   :  { %3636 = sst [smem:[#allocation8_spill]] %s3060_s4 }
  0x19   :  { %s3070_s20 = sld [smem:[%s3629_s0 + %s2949_s15]]   ;;  %s2953_s15 = smov 23  }
  0x1a   :  { %3637 = sst [smem:[#allocation9_spill]] %s3065_s30 }
  0x1b   :  { %s3075_s27 = sld [smem:[%s3629_s0 + %s2950_s22]]   ;;  %s2954_s22 = smov 24  }
  0x1c   :  { %s3080_s4 = sld [smem:[%s3629_s0 + %s2951_s28]]   ;;  %s2955_s28 = smov 25  }
  0x1d   :  { %s3085_s30 = sld [smem:[%s3629_s0 + %s2952_s7]]   ;;  %s2956_s7 = smov 26  }
  0x1f   :  { %3638 = sst [smem:[#allocation10_spill]] %s3070_s20 }
  0x20   :  { %s3090_s20 = sld [smem:[%s3629_s0 + %s2953_s15]]   ;;  %s2957_s15 = smov 27  }
  0x21   :  { %3639 = sst [smem:[#allocation11_spill]] %s3075_s27 }
  0x22   :  { %3640 = sst [smem:[#allocation12_spill]] %s3080_s4 }
  0x23   :  { %3641 = sst [smem:[#allocation13_spill]] %s3085_s30 }
  0x24   :  { %s3095_s27 = sld [smem:[%s3629_s0 + %s2954_s22]]   ;;  %s2958_s22 = smov 28  }
  0x25   :  { %s3100_s4 = sld [smem:[%s3629_s0 + %s2955_s28]]   ;;  %s2959_s28 = smov 29  }
  0x26   :  { %3642 = sst [smem:[#allocation14_spill]] %s3090_s20 }
  0x27   :  { %s3105_s30 = sld [smem:[%s3629_s0 + %s2956_s7]]  }
  0x28   :  { %s3110_s20 = sld [smem:[%s3629_s0 + %s2957_s15]]  }
  0x2a   :  { %3643 = sst [smem:[#allocation15_spill]] %s3095_s27 }
  0x2b   :  { %3644 = sst [smem:[#allocation16_spill]] %s3100_s4 }
  0x2c   :  { %s3115_s27 = sld [smem:[%s3629_s0 + %s2958_s22]]  }
  0x2d   :  { %s3120_s4 = sld [smem:[%s3629_s0 + %s2959_s28]]  }
  0x2e   :  { %v124_v0 = vld [vmem:[%s3000_s25] sm:$0xff]  ;;  %v125_v1 = vld [vmem:[%s3000_s25 + $0x8] sm:$0xff]  ;;  %v126_v2 = vld [vmem:[%s3000_s25 + $0x10] sm:$0xff]  ;;  %vm135_vm0 = vcmask 261120   ;;  %v2960_v6 = vmov 0  }
  0x2f   :  { %v2656_v3 = vpack.c.bf16 %v125_v1, %v124_v0  ;;  %v127_v4 = vld [vmem:[%s3000_s25 + $0x18] sm:$0xff]  ;;  %v122_v5 = vld [vmem:[%s2975_s5] sm:$0xff]  ;;  %2800 = vset.pattern.permute.xlu0 %v2960_v6  ;;  %2801 = vset.pattern.permute.xlu1 %v2960_v6  ;;  %v224_v9 = vld [vmem:[%s3010_s3 + $0x8] sm:$0xff] }
  0x30   :  { %v2660_v7 = vpack.c.bf16 %v127_v4, %v126_v2  ;;  %2470 = vmatprep.mubr.msk.f32.mxu0 %vm135_vm0, %v122_v5  ;;  %v223_v8 = vld [vmem:[%s3010_s3] sm:$0xff]  ;;  %v225_v10 = vld [vmem:[%s3010_s3 + $0x10] sm:$0xff]  ;;  %v226_v12 = vld [vmem:[%s3010_s3 + $0x18] sm:$0xff] }
  0x31   :  { %2657 = vmatprep.subr.bf16.mxu0 %v2656_v3  ;;  %v2664_v11 = vpack.c.bf16 %v224_v9, %v223_v8  ;;  %v217_v13 = vld [vmem:[%s2980_s9] sm:$0xff]  ;;  %v2668_v14 = vpack.c.bf16 %v226_v12, %v225_v10  ;;  %v348_v16 = vld [vmem:[%s2985_s13 + $0x8] sm:$0xff] }
  0x32   :  { %2659 = vmatpush3.bf16.msra.mxu0 %v2656_v3  ;;  %2481 = vmatprep.mubr.msk.f32.mxu1 %vm135_vm0, %v217_v13  ;;  %v347_v15 = vld [vmem:[%s2985_s13] sm:$0xff]  ;;  %v123_v18 = vld [vmem:[%s2975_s5 + $0x8] sm:$0xff] }
  0x33   :  { %2661 = vmatprep.subr.bf16.mxu0 %v2660_v7  ;;  %2665 = vmatprep.subr.bf16.mxu1 %v2664_v11  ;;  %v353_v17 = vld [vmem:[%s2990_s17] sm:$0xff]  ;;  %v354_v19 = vld [vmem:[%s2990_s17 + $0x8] sm:$0xff] }
  0x34   :  { %2667 = vmatpush3.bf16.msra.mxu1 %v2664_v11  ;;  %362 = vperm.xlu0 %2800, %v347_v15  }
  0x35   :  { %2669 = vmatprep.subr.bf16.mxu1 %v2668_v14  ;;  %365 = vperm.xlu1 %2801, %v348_v16  }
  0x36   :  { %2663 = vmatpush3.bf16.msra.mxu0 %v2660_v7 }
  0x37   :  { %65 = vsyncpa [#allocation3], 0  ;;  %v218_v20 = vld [vmem:[%s2980_s9 + $0x8] sm:$0xff]  ;;  %v219_v21 = vld [vmem:[%s2980_s9 + $0x10] sm:$0xff]  ;;  %v359_v32 = vlaneseq  ;;  %v2961_v35 = vmov 0.0   ;;  %vm441_vm3 = vcmask 130048  }
  0x38   :  { %2671 = vmatpush3.bf16.msra.mxu1 %v2668_v14  ;;  %398 = vperm.xlu0 %2800, %v353_v17   ;;  %v349_v22 = vld [vmem:[%s2985_s13 + $0x10] sm:$0xff]  ;;  %v220_v24 = vld [vmem:[%s2980_s9 + $0x18] sm:$0xff]  ;;  %v221_v25 = vld [vmem:[%s2980_s9 + $0x20] sm:$0xff]  ;;  %s2962_s0 = smov 96   ;;  %s3647_s25 = sld [smem:[#allocation9_spill]] }
  0x39   :  { %2471 = vmatmul.mubr.msk.f32.vlgmr.msra.gmra.mrb[0].mxu0 %vm135_vm0, %v123_v18  ;;  %401 = vperm.xlu1 %2801, %v354_v19   ;;  %v355_v23 = vld [vmem:[%s2990_s17 + $0x10] sm:$0xff]  ;;  %v356_v26 = vld [vmem:[%s2990_s17 + $0x18] sm:$0xff]  ;;  %v222_v28 = vld [vmem:[%s2980_s9 + $0x28] sm:$0xff]  ;;  %v3156_v33 = vand.u32 127, %v359_v32  ;;  %s3650_s3 = sld [smem:[#allocation7_spill]] }
  0x3a   :  { %v350_v27 = vld [vmem:[%s2985_s13 + $0x18] sm:$0xff]  ;;  %v351_v29 = vld [vmem:[%s2985_s13 + $0x20] sm:$0xff]  ;;  %v352_v30 = vld [vmem:[%s2985_s13 + $0x28] sm:$0xff]  ;;  %s2963_s13 = smov 32  }
  0x3b   :  { %2482 = vmatmul.mubr.msk.f32.vlgmr.msra.gmra.mrb[0].mxu1 %vm135_vm0, %v218_v20  ;;  %v2262_v39 = vld [vmem:[%s3005_s29] ss:$0 sm:$0xff]  ;;  %v358_v61 = vld [vmem:[%s2990_s17 + $0x28] sm:$0xff]  ;;  %s3648_s29 = sld [smem:[#allocation15_spill]] }
  0x3c   :  { %2484 = vmatprep.mubr.msk.f32.mxu1 %vm135_vm0, %v219_v21  ;;  %368 = vperm.xlu0 %2800, %v349_v22   ;;  %v2265_v45 = vld [vmem:[%s3015_s8] ss:$0 sm:$0xff]  ;;  %v1583_v20 = vld [vmem:[%s2995_s21 + $0x8] sm:$0xff]  ;;  %s3651_s8 = sld [smem:[#allocation8_spill]] }
  0x3d   :  { %404 = vperm.xlu1 %2801, %v355_v23   ;;  %v357_v55 = vld [vmem:[%s2990_s17 + $0x20] sm:$0xff]  ;;  %s3645_s17 = sld [smem:[#allocation5_spill]] }
  0x3f   :  { %2485 = vmatmul.mubr.msk.f32.gmra.mrb[2].mxu1 %vm135_vm0, %v220_v24 }
  0x40   :  { %2487 = vmatprep.mubr.msk.f32.mxu1 %vm135_vm0, %v221_v25  ;;  %407 = vperm.xlu0 %2800, %v356_v26   ;;  %v836_v25 = vld [vmem:[%s3020_s14] sm:$0xff]  ;;  %v837_v26 = vld [vmem:[%s3020_s14 + $0x8] sm:$0xff] }
  0x41   :  { %371 = vperm.xlu1 %2801, %v350_v27   ;;  %v2680_v27 = vpack.c.bf16 %v837_v26, %v836_v25 }
  0x43   :  { %2488 = vmatmul.mubr.msk.f32.gmra.mrb[4].mxu1 %vm135_vm0, %v222_v28  ;;  %v838_v28 = vld [vmem:[%s3020_s14 + $0x10] sm:$0xff] }
  0x45   :  { %374 = vperm.xlu1 %2801, %v351_v29   ;;  %v839_v29 = vld [vmem:[%s3020_s14 + $0x18] sm:$0xff]  ;;  %s3652_s14 = sld [smem:[#allocation10_spill]] }
  0x49   :  { %377 = vperm.xlu1 %2801, %v352_v30   ;;  %v2684_v30 = vpack.c.bf16 %v839_v29, %v838_v28 }
  0xb3   :  { %v363_v31 = vpop.permute.xlu0 %362 }
  0xb4   :  { %vm379_vm1 = vcmp.eq.s32.totalorder %v3156_v33, %v363_v31  ;;  %v3167_v38 = vpop.permute.xlu1 %365 }
  0xb5   :  { %v2272_v36 = vsel %vm379_vm1, 1.0, %v2961_v35  ;;  %vm380_vm7 = vcmp.eq.s32.totalorder %v3156_v33, %v3167_v38 }
  0xb6   :  { %2494 = vmatprep.mubr.msk.f32.mxu0 %vm441_vm3, %v2272_v36  ;;  %v2273_v10 = vsel %vm380_vm7, 1.0, %v2961_v35 }
  0xb7   :  { %v399_v34 = vpop.permute.xlu0 %398 }
  0xb8   :  { %vm415_vm2 = vcmp.eq.s32.totalorder %v3156_v33, %v399_v34  ;;  %v402_v40 = vpop.permute.xlu1 %401 }
  0xb9   :  { %v3162_v37 = vsel %vm415_vm2, 1.0, %v2961_v35  ;;  %vm416_vm4 = vcmp.eq.s32.totalorder %v3156_v33, %v402_v40 }
  0xba   :  { %2507 = vmatprep.mubr.msk.f32.mxu1 %vm441_vm3, %v3162_v37  ;;  %v3183_v58 = vsel %vm416_vm4, 1.0, %v2961_v35 }
  0xbb   :  { %v369_v41 = vpop.permute.xlu0 %368 }
  0xbc   :  { %v405_v52 = vpop.permute.xlu1 %404  ;;  %vm381_vm8 = vcmp.eq.s32.totalorder %v3156_v33, %v369_v41 }
  0xbd   :  { %vm417_vm5 = vcmp.eq.s32.totalorder %v3156_v33, %v405_v52  ;;  %v2274_v11 = vsel %vm381_vm8, 1.0, %v2961_v35 }
  0xbe   :  { %v3186_v60 = vsel %vm417_vm5, 1.0, %v2961_v35 }
  0xbf   :  { %v408_v53 = vpop.permute.xlu0 %407 }
  0xc0   :  { %vm418_vm6 = vcmp.eq.s32.totalorder %v3156_v33, %v408_v53  ;;  %v372_v4 = vpop.permute.xlu1 %371 }
  0xc1   :  { %v3194_v63 = vsel %vm418_vm6, 1.0, %v2961_v35  ;;  %vm382_vm9 = vcmp.eq.s32.totalorder %v3156_v33, %v372_v4 }
  0xc2   :  { %v2275_v13 = vsel %vm382_vm9, 1.0, %v2961_v35 }
  0xc4   :  { %v375_v9 = vpop.permute.xlu1 %374 }
  0xc5   :  { %vm383_vm10 = vcmp.eq.s32.totalorder %v3156_v33, %v375_v9 }
  0xc6   :  { %v2276_v14 = vsel %vm383_vm10, 1.0, %v2961_v35 }
  0xc8   :  { %v378_v12 = vpop.permute.xlu1 %377 }
  0xc9   :  { %vm384_vm11 = vcmp.eq.s32.totalorder %v3156_v33, %v378_v12 }
  0xca   :  { %v2277_v15 = vsel %vm384_vm11, 1.0, %v2961_v35 }
 0x10c   :  { %v2472_v42 = vpop.f32.mrb[0].mxu0 }
 0x10d   :  { %v214_v43 = vadd.f32 %v2472_v42, %v2262_v39  ;;  %v208_v44 = vpop.f32.mrb[1].mxu0 }
 0x10e   :  { %v209_v46 = vadd.f32 %v2262_v39, %v208_v44  ;;  %v2483_v47 = vpop.f32.mrb[0].mxu1 }
 0x10f   :  { %v318_v48 = vpop.f32.mrb[1].mxu1  ;;  %v3200_v1 = vadd.f32 %v2483_v47, %v2265_v45 }
 0x110   :  { %v2802_v49 = vpack.i.bf16 %v214_v43, %v209_v46  ;;  %v2676_v50 = vpack.c.bf16 %v214_v43, %v209_v46  ;;  %v3171_v51 = vadd.f32 %v2265_v45, %v318_v48 }
 0x112   :  { %2803 = vrot.lane.b32.xlu0 %v2802_v49, %s2962_s0  ;;  %2677 = vmatprep.subr.bf16.mxu1 %v2676_v50  ;;  %v2486_v54 = vpop.f32.mrb[2].mxu1 }
 0x113   :  { %2679 = vmatpush3.bf16.msra.mxu1 %v2676_v50  ;;  %806 = vrot.lane.b32.xlu1 %v3171_v51, %s2962_s0  ;;  %v328_v56 = vpop.f32.mrb[3].mxu1  ;;  %v3206_v2 = vadd.f32 %v2486_v54, %v2265_v45 }
 0x114   :  { %v3179_v57 = vadd.f32 %v2265_v45, %v328_v56 }
 0x116   :  { %410 = vperm.xlu0 %2800, %v357_v55   ;;  %v2489_v59 = vpop.f32.mrb[4].mxu1  ;;  %2508 = vmatmul.mubr.msk.f32.vlgmr.msra.gmra.mrb[6].mxu1 %vm441_vm3, %v3183_v58 }
 0x117   :  { %810 = vrot.lane.b32.xlu1 %v3179_v57, %s2962_s0  ;;  %v338_v62 = vpop.f32.mrb[5].mxu1  ;;  %2510 = vmatprep.mubr.msk.f32.mxu1 %vm441_vm3, %v3186_v60  ;;  %v3210_v3 = vadd.f32 %v2489_v59, %v2265_v45 }
 0x118   :  { %v3198_v0 = vadd.f32 %v2265_v45, %v338_v62 }
 0x11a   :  { %413 = vperm.xlu0 %2800, %v358_v61   ;;  %2511 = vmatmul.mubr.msk.f32.gmra.mrb[8].mxu1 %vm441_vm3, %v3194_v63 }
 0x11b   :  { %814 = vrot.lane.b32.xlu1 %v3198_v0, %s2962_s0 }
 0x11e   :  { %808 = vrot.lane.b32.xlu0 %v3200_v1, %s2962_s0 }
 0x122   :  { %812 = vrot.lane.b32.xlu0 %v3206_v2, %s2962_s0 }
 0x126   :  { %816 = vrot.lane.b32.xlu0 %v3210_v3, %s2962_s0 }
 0x144   :  { %977 = vxpose.xlu1.b32.start [1/6] (short) (narrow) %v3162_v37, 16 }
 0x148   :  { %978 = vxpose.xlu1.b32.cont [2/6] (short) (narrow) %v3183_v58, 16 }
 0x14c   :  { %979 = vxpose.xlu1.b32.cont [3/6] (short) (narrow) %v3186_v60, 16 }
 0x150   :  { %980 = vxpose.xlu1.b32.cont [4/6] (short) (narrow) %v3194_v63, 16 }
 0x184   :  { %v2804_v5 = vpop.permute.xlu0 %2803 }
 0x185   :  { %v2806_v6 = vunpack.i.h.bf16 %v2804_v5  ;;  %v2805_v7 = vunpack.i.l.bf16 %v2804_v5 }
 0x187   :  { %v2672_v8 = vpack.c.bf16 %v2806_v6, %v2805_v7 }
 0x189   :  { %2673 = vmatprep.subr.bf16.mxu0 %v2672_v8 }
 0x18a   :  { %2675 = vmatpush3.bf16.msra.mxu0 %v2672_v8 }
 0x18b   :  { %2681 = vmatprep.subr.bf16.mxu0 %v2680_v27 }
 0x18d   :  { %2495 = vmatmul.mubr.msk.f32.vlgmr.msra.gmra.mrb[2].mxu0 %vm441_vm3, %v2273_v10 }
 0x18e   :  { %2497 = vmatprep.mubr.msk.f32.mxu0 %vm441_vm3, %v2274_v11  ;;  %2683 = vmatpush3.bf16.msra.mxu0 %v2680_v27 }
 0x18f   :  { %2685 = vmatprep.subr.bf16.mxu0 %v2684_v30 }
 0x191   :  { %2498 = vmatmul.mubr.msk.f32.gmra.mrb[4].mxu0 %vm441_vm3, %v2275_v13 }
 0x192   :  { %2500 = vmatprep.mubr.msk.f32.mxu0 %vm441_vm3, %v2276_v14  ;;  %2687 = vmatpush3.bf16.msra.mxu0 %v2684_v30 }
 0x195   :  { %v411_v16 = vpop.permute.xlu0 %410  ;;  %2501 = vmatmul.mubr.msk.f32.gmra.mrb[6].mxu0 %vm441_vm3, %v2277_v15 }
 0x196   :  { %vm419_vm12 = vcmp.eq.s32.totalorder %v3156_v33, %v411_v16 }
 0x197   :  { %v3238_v17 = vsel %vm419_vm12, 1.0, %v2961_v35 }
 0x198   :  { %981 = vxpose.xlu1.b32.cont [5/6] (short) (narrow) %v3238_v17, 16  ;;  %2513 = vmatprep.mubr.msk.f32.mxu1 %vm441_vm3, %v3238_v17 }
 0x199   :  { %v414_v18 = vpop.permute.xlu0 %413 }
 0x19a   :  { %vm420_vm13 = vcmp.eq.s32.totalorder %v3156_v33, %v414_v18 }
 0x19b   :  { %v3245_v19 = vsel %vm420_vm13, 1.0, %v2961_v35 }
 0x19c   :  { %982 = vxpose.xlu1.b32.end [6/6] (short) (narrow) %v3245_v19, 16  ;;  %2514 = vmatmul.mubr.msk.f32.gmra.mrb[10].mxu1 %vm441_vm3, %v3245_v19 }
 0x1ba   :  { %1591 = vperm.xlu1 %2801, %v1583_v20  }
 0x1e9   :  { %v2509_v21 = vpop.f32.mrb[6].mxu1 }
 0x1ea   :  { %v639_v22 = vpop.f32.mrb[7].mxu1 }
 0x1ed   :  { %v2512_v23 = vpop.f32.mrb[8].mxu1 }
 0x1ee   :  { %v649_v24 = vpop.f32.mrb[9].mxu1 }
 0x260   :  { %v3255_v31 = vpop.f32.mrb[2].mxu0 }
 0x261   :  { %v669_v32 = vadd.f32 %v2509_v21, %v3255_v31  ;;  %v3258_v33 = vpop.f32.mrb[3].mxu0 }
 0x262   :  { %v668_v34 = vadd.f32 %v639_v22, %v3258_v33 }
 0x263   :  { %v675_v35 = vmul.f32 %v669_v32, %v3200_v1 }
 0x264   :  { %v674_v36 = vmul.f32 %v668_v34, %v3171_v51  ;;  %v3263_v38 = vpop.f32.mrb[4].mxu0 }
 0x265   :  { %v681_v39 = vmax.f32 %v675_v35, 0.0  ;;  %v735_v40 = vsub.f32 0.0, %v675_v35  ;;  %v671_v41 = vadd.f32 %v2512_v23, %v3263_v38  ;;  %v3266_v42 = vpop.f32.mrb[5].mxu0 }
 0x266   :  { %v680_v43 = vmax.f32 %v674_v36, 0.0  ;;  %v734_v44 = vsub.f32 0.0, %v674_v36  ;;  %v670_v45 = vadd.f32 %v649_v24, %v3266_v42 }
 0x267   :  { %v3269_v46 = vadd.f32 1e-08, %v681_v39  ;;  %v741_v47 = vmax.f32 %v735_v40, 0.0  ;;  %v677_v48 = vmul.f32 %v671_v41, %v3206_v2 }
 0x268   :  { %v3272_v49 = vadd.f32 1e-08, %v680_v43  ;;  %v740_v50 = vmax.f32 %v734_v44, 0.0  ;;  %v676_v51 = vmul.f32 %v670_v45, %v3179_v57  ;;  %v3275_v52 = vpop.f32.mrb[6].mxu0 }
 0x269   :  { %v3277_v53 = vadd.f32 1e-08, %v741_v47  ;;  %v683_v54 = vmax.f32 %v677_v48, 0.0  ;;  %v737_v55 = vsub.f32 0.0, %v677_v48  ;;  %v3279_v56 = vpop.f32.mrb[7].mxu0  ;;  %2837 = vrsqrt.f32 %v3269_v46 }
 0x26a   :  { %2839 = vrsqrt.f32 %v3272_v49  ;;  %v3283_v59 = vadd.f32 1e-08, %v740_v50  ;;  %v682_v61 = vmax.f32 %v676_v51, 0.0  ;;  %v736_v62 = vsub.f32 0.0, %v676_v51  ;;  %v809_v50 = vpop.permute.xlu0 %808 }
 0x26b   :  { %v3285_v1 = vadd.f32 1e-08, %v683_v54  ;;  %v743_v2 = vmax.f32 %v737_v55, 0.0  ;;  %vm701_vm14 = vcmp.eq.f32.partialorder %v3269_v46, inf  ;;  %vm703_vm15 = vcmp.eq.f32.partialorder %v3269_v46, 0.0 }
 0x26c   :  { %2841 = vrsqrt.f32 %v3283_v59  ;;  %v3288_v57 = vadd.f32 1e-08, %v682_v61  ;;  %v742_v4 = vmax.f32 %v736_v62, 0.0  ;;  %v704_v10 = vand.u32 2147483648, %v3269_v46 }
 0x26d   :  { %v3290_v5 = vadd.f32 1e-08, %v743_v2  ;;  %2843 = vrsqrt.f32 %v3277_v53  ;;  %vm761_vm1 = vcmp.eq.f32.partialorder %v3277_v53, inf  ;;  %v764_v12 = vand.u32 2147483648, %v3277_v53 }
 0x26e   :  { %2845 = vrsqrt.f32 %v3288_v57  ;;  %v3294_v6 = vadd.f32 1e-08, %v742_v4  ;;  %vm763_vm2 = vcmp.eq.f32.partialorder %v3277_v53, 0.0  ;;  %v718_v14 = vand.u32 2147483648, %v3285_v1 }
 0x26f   :  { %v2515_v7 = vpop.f32.mrb[10].mxu1  ;;  %2847 = vrsqrt.f32 %v3285_v1  ;;  %v778_v15 = vand.u32 2147483648, %v3290_v5  ;;  %vm694_vm4 = vcmp.eq.f32.partialorder %v3272_v49, inf  ;;  %vm715_vm5 = vcmp.eq.f32.partialorder %v3285_v1, inf }
 0x270   :  { %2849 = vrsqrt.f32 %v3294_v6  ;;  %v673_v8 = vadd.f32 %v2515_v7, %v3275_v52  ;;  %v659_v9 = vpop.f32.mrb[11].mxu1  ;;  %vm696_vm6 = vcmp.eq.f32.partialorder %v3272_v49, 0.0  ;;  %v697_v20 = vand.u32 2147483648, %v3272_v49 }
 0x271   :  { %v672_v11 = vadd.f32 %v659_v9, %v3279_v56  ;;  %2851 = vrsqrt.f32 %v3290_v5  ;;  %vm754_vm7 = vcmp.eq.f32.partialorder %v3283_v59, inf  ;;  %vm756_vm8 = vcmp.eq.f32.partialorder %v3283_v59, 0.0 }
 0x272   :  { %v679_v13 = vmul.f32 %v673_v8, %v3210_v3  ;;  %vm775_vm9 = vcmp.eq.f32.partialorder %v3290_v5, inf  ;;  %v757_v26 = vand.u32 2147483648, %v3283_v59  ;;  %vm717_vm10 = vcmp.eq.f32.partialorder %v3285_v1, 0.0  ;;  %v807_v8 = vpop.permute.xlu1 %806 }
 0x273   :  { %v2838_v16 = vpop.eup %2837  ;;  %v678_v18 = vmul.f32 %v672_v11, %v3198_v0  ;;  %vm777_vm11 = vcmp.eq.f32.partialorder %v3290_v5, 0.0  ;;  %vm708_vm12 = vcmp.eq.f32.partialorder %v3288_v57, inf  ;;  %vm710_vm13 = vcmp.eq.f32.partialorder %v3288_v57, 0.0 }
 0x274   :  { %v2840_v3 = vpop.eup %2839  ;;  %v685_v21 = vmax.f32 %v679_v13, 0.0  ;;  %v739_v22 = vsub.f32 0.0, %v679_v13  ;;  %v700_v23 = vmul.f32 %v2838_v16, %v3269_v46  ;;  %v711_v36 = vand.u32 2147483648, %v3288_v57 }
 0x275   :  { %v684_v24 = vmax.f32 %v678_v18, 0.0  ;;  %v738_v25 = vsub.f32 0.0, %v678_v18  ;;  %v693_v0 = vmul.f32 %v2840_v3, %v3272_v49  ;;  %v771_v18 = vand.u32 2147483648, %v3294_v6 }
 0x276   :  { %v2842_v27 = vpop.eup %2841  ;;  %v3321_v28 = vadd.f32 1e-08, %v685_v21  ;;  %v745_v29 = vmax.f32 %v739_v22, 0.0  ;;  %v702_v30 = vsel %vm701_vm14, %v3269_v46, %v700_v23  ;;  %vm768_vm14 = vcmp.eq.f32.partialorder %v3294_v6, inf }
 0x277   :  { %v2844_v32 = vpop.eup %2843  ;;  %v3329_v34 = vadd.f32 1e-08, %v684_v24  ;;  %v744_v35 = vmax.f32 %v738_v25, 0.0  ;;  %v705_v40 = vsel %vm703_vm15, %v704_v10, %v702_v30  ;;  %v695_v43 = vsel %vm694_vm4, %v3272_v49, %v693_v0 }
 0x278   :  { %v2846_v39 = vpop.eup %2845  ;;  %v760_v41 = vmul.f32 %v2844_v32, %v3277_v53  ;;  %v753_v44 = vmul.f32 %v2842_v27, %v3283_v59  ;;  %v3340_v47 = vadd.f32 1e-08, %v745_v29  ;;  %v698_v4 = vsel %vm696_vm6, %v697_v20, %v695_v43  ;;  %v813_v20 = vpop.permute.xlu0 %812 }
 0x279   :  { %v2848_v45 = vpop.eup %2847  ;;  %2853 = vrsqrt.f32 %v3329_v34  ;;  %v3343_v48 = vadd.f32 1e-08, %v744_v35  ;;  %v707_v51 = vmul.f32 %v2846_v39, %v3288_v57  ;;  %vm770_vm15 = vcmp.eq.f32.partialorder %v3294_v6, 0.0 }
 0x27a   :  { %v2850_v46 = vpop.eup %2849  ;;  %v762_v54 = vsel %vm761_vm1, %v3277_v53, %v760_v41  ;;  %v714_v55 = vmul.f32 %v2848_v45, %v3285_v1  ;;  %v755_v61 = vsel %vm754_vm7, %v3283_v59, %v753_v44  ;;  %2855 = vrsqrt.f32 %v3321_v28 }
 0x27b   :  { %v2852_v62 = vpop.eup %2851  ;;  %2857 = vrsqrt.f32 %v3343_v48  ;;  %v765_v2 = vsel %vm763_vm2, %v764_v12, %v762_v54  ;;  %v758_v7 = vsel %vm756_vm8, %v757_v26, %v755_v61  ;;  %v709_v53 = vsel %vm708_vm12, %v3288_v57, %v707_v51 }
 0x27c   :  { %v795_v9 = vsub.f32 %v705_v40, %v765_v2  ;;  %v716_v10 = vsel %vm715_vm5, %v3285_v1, %v714_v55  ;;  %v774_v11 = vmul.f32 %v2852_v62, %v3290_v5  ;;  %v794_v13 = vsub.f32 %v698_v4, %v758_v7  ;;  %v817_v2 = vpop.permute.xlu0 %816 }
 0x27d   :  { %v767_v12 = vmul.f32 %v2850_v46, %v3294_v6  ;;  %v719_v3 = vsel %vm717_vm10, %v718_v14, %v716_v10  ;;  %2859 = vrsqrt.f32 %v3340_v47  ;;  %v712_v25 = vsel %vm710_vm13, %v711_v36, %v709_v53  ;;  %v811_v14 = vpop.permute.xlu1 %810 }
 0x27e   :  { %v825_v49 = vadd.f32 %v809_v50, %v795_v9  ;;  %v776_v59 = vsel %vm775_vm9, %v3290_v5, %v774_v11  ;;  %v824_v16 = vadd.f32 %v807_v8, %v794_v13  ;;  %vm722_vm1 = vcmp.eq.f32.partialorder %v3329_v34, inf }
 0x27f   :  { %v779_v21 = vsel %vm777_vm11, %v778_v15, %v776_v59  ;;  %v769_v22 = vsel %vm768_vm14, %v3294_v6, %v767_v12  ;;  %v725_v40 = vand.u32 2147483648, %v3329_v34  ;;  %vm782_vm2 = vcmp.eq.f32.partialorder %v3343_v48, inf }
 0x280   :  { %v797_v23 = vsub.f32 %v719_v3, %v779_v21  ;;  %v3385_v24 = vmax.f32 %v824_v16, 0.0  ;;  %v772_v0 = vsel %vm770_vm15, %v771_v18, %v769_v22  ;;  %v3389_v26 = vmax.f32 %v825_v49, 0.0 }
 0x281   :  { %v796_v1 = vsub.f32 %v712_v25, %v772_v0  ;;  %v785_v41 = vand.u32 2147483648, %v3343_v48  ;;  %vm724_vm4 = vcmp.eq.f32.partialorder %v3329_v34, 0.0  ;;  %vm784_vm5 = vcmp.eq.f32.partialorder %v3343_v48, 0.0  ;;  %v815_v55 = vpop.permute.xlu1 %814 }
 0x282   :  { %v827_v27 = vadd.f32 %v813_v20, %v797_v23  ;;  %2524 = vmatprep.mubr.msk.f32.mxu0 %vm135_vm0, %v3385_v24  ;;  %vm729_vm6 = vcmp.eq.f32.partialorder %v3321_v28, inf  ;;  %v732_v61 = vand.u32 2147483648, %v3321_v28  ;;  %vm789_vm7 = vcmp.eq.f32.partialorder %v3340_v47, inf }
 0x283   :  { %v2854_v5 = vpop.eup %2853  ;;  %2525 = vmatmul.mubr.msk.f32.vlgmr.msra.gmra.mrb[8].mxu0 %vm135_vm0, %v3389_v26  ;;  %v826_v6 = vadd.f32 %v811_v14, %v796_v1  ;;  %vm731_vm8 = vcmp.eq.f32.partialorder %v3321_v28, 0.0  ;;  %vm791_vm9 = vcmp.eq.f32.partialorder %v3340_v47, 0.0  ;;  %vm1009_vm10 = vcmask 392192  }
 0x284   :  { %v2856_v15 = vpop.eup %2855  ;;  %v721_v29 = vmul.f32 %v2854_v5, %v3329_v34  ;;  %v3399_v32 = vmax.f32 %v827_v27, 0.0  ;;  %vm1218_vm11 = vcmask 1043456   ;;  %vm1855_vm12 = vcmask 523264  }
 0x285   :  { %v2858_v30 = vpop.eup %2857  ;;  %v3396_v57 = vmax.f32 %v826_v6, 0.0  ;;  %v728_v35 = vmul.f32 %v2856_v15, %v3321_v28 }
 0x286   :  { %v723_v36 = vsel %vm722_vm1, %v3329_v34, %v721_v29  ;;  %v781_v39 = vmul.f32 %v2858_v30, %v3343_v48  ;;  %v792_v34 = vand.u32 2147483648, %v3340_v47 }
 0x287   :  { %2527 = vmatprep.mubr.msk.f32.mxu0 %vm135_vm0, %v3396_v57  ;;  %v2860_v44 = vpop.eup %2859  ;;  %v726_v45 = vsel %vm724_vm4, %v725_v40, %v723_v36  ;;  %v730_v51 = vsel %vm729_vm6, %v3321_v28, %v728_v35  ;;  %v993_v28 = vpop.trf.xlu1 }
 0x288   :  { %2528 = vmatmul.mubr.msk.f32.gmra.mrb[10].mxu0 %vm135_vm0, %v3399_v32  ;;  %v783_v43 = vsel %vm782_vm2, %v3343_v48, %v781_v39  ;;  %v788_v46 = vmul.f32 %v2860_v44, %v3340_v47  ;;  %v733_v4 = vsel %vm731_vm8, %v732_v61, %v730_v51  ;;  %2545 = vmatprep.mubr.msk.f32.mxu1 %vm1009_vm10, %v993_v28 }
 0x289   :  { %v786_v50 = vsel %vm784_vm5, %v785_v41, %v783_v43 }
 0x28a   :  { %v798_v54 = vsub.f32 %v726_v45, %v786_v50  ;;  %v790_v48 = vsel %vm789_vm7, %v3340_v47, %v788_v46  ;;  %v1198_v45 = vld [vmem:[%s3030_s24] sm:$0xf]  ;;  %s3654_s24 = sld [smem:[#allocation12_spill]] }
 0x28b   :  { %v793_v7 = vsel %vm791_vm9, %v792_v34, %v790_v48  ;;  %v3434_v40 = vpop.trf.xlu1 }
 0x28c   :  { %v828_v62 = vadd.f32 %v815_v55, %v798_v54  ;;  %v799_v8 = vsub.f32 %v733_v4, %v793_v7 }
 0x28e   :  { %v3423_v9 = vmax.f32 %v828_v62, 0.0  ;;  %v829_v10 = vadd.f32 %v817_v2, %v799_v8 }
 0x290   :  { %2530 = vmatprep.mubr.msk.f32.mxu0 %vm135_vm0, %v3423_v9  ;;  %v3427_v11 = vmax.f32 %v829_v10, 0.0 }
 0x292   :  { %2531 = vmatmul.mubr.msk.f32.gmra.mrb[12].mxu0 %vm135_vm0, %v3427_v11 }
 0x293   :  { %2552 = vmatprep.mubr.msk.f32.mxu0 %vm441_vm3, %v3162_v37 }
 0x356   :  { %v2526_v47 = vpop.f32.mrb[8].mxu0 }
 0x357   :  { %v2303_v13 = vclamps-f32 %v2526_v47, 5.0  ;;  %v924_v53 = vpop.f32.mrb[9].mxu0 }
 0x358   :  { %v2302_v12 = vclamps-f32 %v924_v53, 5.0 }
 0x359   :  { %v967_v49 = vmul.f32 1.442695, %v2303_v13 }
 0x35a   :  { %v965_v59 = vmul.f32 1.442695, %v2302_v12 }
 0x35b   :  { %2861 = vpow2.f32 %v967_v49  ;;  %v2529_v16 = vpop.f32.mrb[10].mxu0 }
 0x35c   :  { %2863 = vpow2.f32 %v965_v59  ;;  %v2305_v18 = vclamps-f32 %v2529_v16, 5.0  ;;  %v934_v20 = vpop.f32.mrb[11].mxu0 }
 0x35d   :  { %v2304_v3 = vclamps-f32 %v934_v20, 5.0 }
 0x35e   :  { %v971_v21 = vmul.f32 1.442695, %v2305_v18 }
 0x35f   :  { %v969_v22 = vmul.f32 1.442695, %v2304_v3 }
 0x360   :  { %2865 = vpow2.f32 %v971_v21 }
 0x361   :  { %2867 = vpow2.f32 %v969_v22 }
 0x365   :  { %v2862_v37 = vpop.eup %2861  ;;  %v2532_v25 = vpop.f32.mrb[12].mxu0 }
 0x366   :  { %v2864_v23 = vpop.eup %2863  ;;  %v2307_v1 = vclamps-f32 %v2532_v25, 5.0  ;;  %v944_v14 = vpop.f32.mrb[13].mxu0 }
 0x367   :  { %v2688_v0 = vpack.c.bf16 %v2862_v37, %v2864_v23  ;;  %v2306_v27 = vclamps-f32 %v944_v14, 5.0 }
 0x368   :  { %v975_v6 = vmul.f32 1.442695, %v2307_v1 }
 0x369   :  { %2689 = vmatprep.subr.bf16.mxu1 %v2688_v0  ;;  %v973_v29 = vmul.f32 1.442695, %v2306_v27 }
 0x36a   :  { %v2866_v5 = vpop.eup %2865  ;;  %2691 = vmatpush3.bf16.msra.mxu1 %v2688_v0  ;;  %2869 = vpow2.f32 %v975_v6 }
 0x36b   :  { %v2868_v15 = vpop.eup %2867  ;;  %2871 = vpow2.f32 %v973_v29 }
 0x36c   :  { %v2692_v30 = vpack.c.bf16 %v2866_v5, %v2868_v15 }
 0x36e   :  { %2693 = vmatprep.subr.bf16.mxu1 %v2692_v30 }
 0x36f   :  { %2695 = vmatpush3.bf16.msra.mxu1 %v2692_v30 }
 0x374   :  { %v2870_v35 = vpop.eup %2869 }
 0x375   :  { %v2872_v36 = vpop.eup %2871 }
 0x376   :  { %v2696_v39 = vpack.c.bf16 %v2870_v35, %v2872_v36 }
 0x378   :  { %2697 = vmatprep.subr.bf16.mxu1 %v2696_v39 }
 0x379   :  { %2699 = vmatpush3.bf16.msra.mxu1 %v2696_v39 }
 0x37a   :  { %2561 = vmatprep.subr.msk.mxu1 %vm1218_vm11, %v1198_v45 }
 0x37c   :  { %2546 = vmatmul.mubr.msk.f32.vlgmr.msra.gmra.mrb[12].mxu1 %vm1009_vm10, %v3434_v40 }
 0x37d   :  { %2562 = vmatpush3.msk.msra.mxu1 %vm1218_vm11, %v1198_v45 }
 0x44f   :  { %v2547_v41 = vpop.f32.mrb[12].mxu1 }
 0x450   :  { %v1082_v43 = vpop.f32.mrb[13].mxu1 }
 0x451   :  { %v2700_v44 = vpack.c.bf16 %v2547_v41, %v1082_v43 }
 0x453   :  { %2701 = vmatprep.subr.bf16.mxu0 %v2700_v44 }
 0x454   :  { %2703 = vmatpush3.bf16.msra.mxu0 %v2700_v44 }
 0x457   :  { %2553 = vmatmul.mubr.msk.f32.vlgmr.msra.gmra.mrb[14].mxu0 %vm441_vm3, %v3183_v58 }
 0x458   :  { %2555 = vmatprep.mubr.msk.f32.mxu0 %vm441_vm3, %v3186_v60 }
 0x45b   :  { %2556 = vmatmul.mubr.msk.f32.gmra.mrb[16].mxu0 %vm441_vm3, %v3194_v63 }
 0x45c   :  { %2558 = vmatprep.mubr.msk.f32.mxu0 %vm441_vm3, %v3238_v17 }
 0x45f   :  { %2559 = vmatmul.mubr.msk.f32.gmra.mrb[18].mxu0 %vm441_vm3, %v3245_v19  ;;  %vm1199_vm3 = vcmask 31744  }
 0x460   :  { %2584 = vmatprep.mubr.msk.f32.mxu0 %vm1009_vm10, %v993_v28 }
 0x52a   :  { %v2554_v50 = vpop.f32.mrb[14].mxu0 }
 0x52b   :  { %v1163_v58 = vadd.f32 1e-16, %v2554_v50  ;;  %v1157_v51 = vpop.f32.mrb[15].mxu0 }
 0x52c   :  { %v1158_v46 = vadd.f32 1e-16, %v1157_v51 }
 0x52d   :  { %2873 = vrcp.f32 %v1163_v58 }
 0x52e   :  { %2875 = vrcp.f32 %v1158_v46  ;;  %v2557_v60 = vpop.f32.mrb[16].mxu0 }
 0x52f   :  { %v1173_v63 = vadd.f32 1e-16, %v2557_v60  ;;  %v1167_v54 = vpop.f32.mrb[17].mxu0 }
 0x530   :  { %v1168_v55 = vadd.f32 1e-16, %v1167_v54 }
 0x531   :  { %2877 = vrcp.f32 %v1173_v63 }
 0x532   :  { %2879 = vrcp.f32 %v1168_v55  ;;  %v2560_v17 = vpop.f32.mrb[18].mxu0 }
 0x533   :  { %v1183_v19 = vadd.f32 1e-16, %v2560_v17  ;;  %v1177_v61 = vpop.f32.mrb[19].mxu0 }
 0x534   :  { %v1178_v34 = vadd.f32 1e-16, %v1177_v61 }
 0x535   :  { %2881 = vrcp.f32 %v1183_v19 }
 0x536   :  { %2883 = vrcp.f32 %v1178_v34 }
 0x537   :  { %v2874_v48 = vpop.eup %2873 }
 0x538   :  { %v2876_v62 = vpop.eup %2875  ;;  %v1193_v4 = vmul.f32 %v2874_v48, %v2862_v37 }
 0x539   :  { %v1192_v2 = vmul.f32 %v2876_v62, %v2864_v23 }
 0x53b   :  { %v2878_v7 = vpop.eup %2877  ;;  %2563 = vmatprep.mubr.msk.f32.mxu1 %vm1199_vm3, %v1192_v2 }
 0x53c   :  { %v2880_v8 = vpop.eup %2879  ;;  %2564 = vmatmul.mubr.msk.f32.vlgmr.msra.gmra.mrb[14].mxu1 %vm1199_vm3, %v1193_v4  ;;  %v1195_v28 = vmul.f32 %v2878_v7, %v2866_v5 }
 0x53d   :  { %v1194_v10 = vmul.f32 %v2880_v8, %v2868_v15 }
 0x53f   :  { %v2882_v47 = vpop.eup %2881  ;;  %2566 = vmatprep.mubr.msk.f32.mxu1 %vm1199_vm3, %v1194_v10 }
 0x540   :  { %v2884_v13 = vpop.eup %2883  ;;  %2567 = vmatmul.mubr.msk.f32.gmra.mrb[16].mxu1 %vm1199_vm3, %v1195_v28  ;;  %v1197_v12 = vmul.f32 %v2882_v47, %v2870_v35 }
 0x541   :  { %v1196_v53 = vmul.f32 %v2884_v13, %v2872_v36 }
 0x543   :  { %2569 = vmatprep.mubr.msk.f32.mxu1 %vm1199_vm3, %v1196_v53 }
 0x544   :  { %2570 = vmatmul.mubr.msk.f32.gmra.mrb[18].mxu1 %vm1199_vm3, %v1197_v12 }
 0x60f   :  { %v2565_v49 = vpop.f32.mrb[14].mxu1 }
 0x610   :  { %v1348_v59 = vmul.f32 %v2565_v49, %v3389_v26  ;;  %1325 = vrot.lane.b32.xlu0 %v2565_v49, %s2963_s13  ;;  %v1288_v16 = vpop.f32.mrb[15].mxu1  ;;  %v1482_v49 = vld [vmem:[%s3025_s19] sm:$0xff] }
 0x611   :  { %v1347_v18 = vmul.f32 %v1288_v16, %v3385_v24 }
 0x613   :  { %v2807_v20 = vpack.i.bf16 %v1348_v59, %v1347_v18  ;;  %v2568_v3 = vpop.f32.mrb[16].mxu1  ;;  %v1483_v59 = vld [vmem:[%s3025_s19 + $0x8] sm:$0xff]  ;;  %v1484_v18 = vld [vmem:[%s3025_s19 + $0x10] sm:$0xff] }
 0x614   :  { %v1350_v21 = vmul.f32 %v2568_v3, %v3399_v32  ;;  %1323 = vrot.lane.b32.xlu0 %v1288_v16, %s2963_s13  ;;  %v1298_v22 = vpop.f32.mrb[17].mxu1  ;;  %v2716_v16 = vpack.c.bf16 %v1483_v59, %v1482_v49  ;;  %v1749_v49 = vld [vmem:[%s3647_s25 + $0x18] sm:$0xff] }
 0x615   :  { %v1349_v37 = vmul.f32 %v1298_v22, %v3396_v57 }
 0x616   :  { %2717 = vmatprep.subr.bf16.mxu1 %v2716_v16 }
 0x617   :  { %v2812_v23 = vpack.i.bf16 %v1350_v21, %v1349_v37  ;;  %v2571_v25 = vpop.f32.mrb[18].mxu1  ;;  %2719 = vmatpush3.bf16.msra.mxu1 %v2716_v16  ;;  %v1985_v16 = vld [vmem:[%s3648_s29] sm:$0xff] }
 0x618   :  { %v1352_v0 = vmul.f32 %v2571_v25, %v3427_v11  ;;  %1329 = vrot.lane.b32.xlu0 %v2568_v3, %s2963_s13  ;;  %v1308_v1 = vpop.f32.mrb[19].mxu1 }
 0x619   :  { %v1351_v14 = vmul.f32 %v1308_v1, %v3423_v9 }
 0x61b   :  { %v2832_v27 = vpack.i.bf16 %v1352_v0, %v1351_v14  ;;  %v1608_v0 = vld [vmem:[%s3045_s12 + $0x8] sm:$0xff]  ;;  %v1609_v14 = vld [vmem:[%s3045_s12 + $0x10] sm:$0xff] }
 0x61c   :  { %1327 = vrot.lane.b32.xlu0 %v1298_v22, %s2963_s13 }
 0x620   :  { %1331 = vrot.lane.b32.xlu0 %v1308_v1, %s2963_s13 }
 0x624   :  { %1333 = vrot.lane.b32.xlu0 %v2571_v25, %s2963_s13  ;;  %v1607_v25 = vld [vmem:[%s3045_s12] sm:$0xff] }
 0x625   :  { %v2724_v1 = vpack.c.bf16 %v1608_v0, %v1607_v25 }
 0x628   :  { %2808 = vrot.lane.b32.xlu0 %v2807_v20, %s2963_s13  ;;  %v1485_v20 = vld [vmem:[%s3025_s19 + $0x18] sm:$0xff]  ;;  %s3653_s19 = sld [smem:[#allocation16_spill]] }
 0x629   :  { %v2720_v3 = vpack.c.bf16 %v1485_v20, %v1484_v18  ;;  %v1986_v18 = vld [vmem:[%s3648_s29 + $0x8] sm:$0xff] }
 0x62a   :  { %v2756_v20 = vpack.c.bf16 %v1986_v18, %v1985_v16 }
 0x62b   :  { %2721 = vmatprep.subr.bf16.mxu1 %v2720_v3 }
 0x62c   :  { %2813 = vrot.lane.b32.xlu0 %v2812_v23, %s2963_s13  ;;  %2723 = vmatpush3.bf16.msra.mxu1 %v2720_v3 }
 0x682   :  { %v1326_v5 = vpop.permute.xlu0 %1325 }
 0x683   :  { %v1342_v15 = vmul.f32 %v3255_v31, %v1326_v5 }
 0x686   :  { %v1324_v6 = vpop.permute.xlu0 %1323 }
 0x687   :  { %v1341_v29 = vmul.f32 %v1324_v6, %v3258_v33 }
 0x689   :  { %v2817_v30 = vpack.i.bf16 %v1342_v15, %v1341_v29 }
 0x68a   :  { %v1330_v35 = vpop.permute.xlu0 %1329 }
 0x68b   :  { %2818 = vrot.lane.b32.xlu0 %v2817_v30, %s2962_s0  ;;  %v1344_v39 = vmul.f32 %v3263_v38, %v1330_v35  ;;  %v1592_v30 = vpop.permute.xlu1 %1591  ;;  %v2328_v35 = vld [vmem:[%s3040_s6] ss:$0 sm:$0xff]  ;;  %s2964_s6 = smov [#allocation2]  }
 0x68e   :  { %v1328_v36 = vpop.permute.xlu0 %1327 }
 0x68f   :  { %v1343_v41 = vmul.f32 %v1328_v36, %v3266_v42 }
 0x691   :  { %v2822_v43 = vpack.i.bf16 %v1344_v39, %v1343_v41  ;;  %v2327_v41 = vld [vmem:[%s3645_s17] ss:$0 sm:$0xff] }
 0x692   :  { %v1332_v44 = vpop.permute.xlu0 %1331 }
 0x693   :  { %2823 = vrot.lane.b32.xlu0 %v2822_v43, %s2962_s0  ;;  %v1345_v50 = vmul.f32 %v1332_v44, %v3279_v56 }
 0x696   :  { %v1334_v45 = vpop.permute.xlu0 %1333 }
 0x697   :  { %v1346_v31 = vmul.f32 %v3275_v52, %v1334_v45 }
 0x699   :  { %v2827_v58 = vpack.i.bf16 %v1346_v31, %v1345_v50 }
 0x69a   :  { %v2809_v33 = vpop.permute.xlu0 %2808 }
 0x69b   :  { %2828 = vrot.lane.b32.xlu0 %v2827_v58, %s2962_s0  ;;  %v2811_v38 = vunpack.i.h.bf16 %v2809_v33  ;;  %v2810_v60 = vunpack.i.l.bf16 %v2809_v33 }
 0x69e   :  { %v2814_v51 = vpop.permute.xlu0 %2813 }
 0x69f   :  { %2833 = vrot.lane.b32.xlu0 %v2832_v27, %s2963_s13  ;;  %v2816_v56 = vunpack.i.h.bf16 %v2814_v51  ;;  %v2815_v19 = vunpack.i.l.bf16 %v2814_v51  ;;  %v1610_v27 = vld [vmem:[%s3045_s12 + $0x18] sm:$0xff]  ;;  %s2218_s12 = sshll.u32 %s2964_s6, 4  ;;  %s2219_s12 = int_to_ptr.vmem [resolvable:$true] %s2218_s12 }
 0x6a0   :  { %v2728_v5 = vpack.c.bf16 %v1610_v27, %v1609_v14  ;;  %p2912_p1 = scmp.lt.s32.totalorder %s2219_s12, %s2219_s12 }
 0x6fd   :  { %v2819_v46 = vpop.permute.xlu0 %2818 }
 0x6fe   :  { %v2821_v42 = vunpack.i.h.bf16 %v2819_v46  ;;  %v2820_v63 = vunpack.i.l.bf16 %v2819_v46 }
 0x700   :  { %v1401_v54 = vsel %vm135_vm0, %v2820_v63, %v2810_v60  ;;  %v1402_v55 = vsel %vm135_vm0, %v2821_v42, %v2811_v38 }
 0x701   :  { %v2704_v17 = vpack.c.bf16 %v1402_v55, %v1401_v54  ;;  %v2905_v54 = vld [vmem:[%s2975_s5 + $0x8] sm:$0xff] }
 0x703   :  { %2705 = vmatprep.subr.bf16.mxu0 %v2704_v17 }
 0x704   :  { %2707 = vmatpush3.bf16.msra.mxu0 %v2704_v17  ;;  %v2906_v17 = vld [vmem:[%s2975_s5] sm:$0xff]  ;;  %s3649_s5 = sld [smem:[#allocation11_spill]] }
 0x705   :  { %v2824_v52 = vpop.permute.xlu0 %2823 }
 0x706   :  { %v2826_v61 = vunpack.i.h.bf16 %v2824_v52  ;;  %v2825_v34 = vunpack.i.l.bf16 %v2824_v52 }
 0x708   :  { %v1403_v48 = vsel %vm135_vm0, %v2825_v34, %v2815_v19  ;;  %v1404_v62 = vsel %vm135_vm0, %v2826_v61, %v2816_v56 }
 0x709   :  { %v2708_v2 = vpack.c.bf16 %v1404_v62, %v1403_v48 }
 0x70a   :  { %v1840_v3 = vld [vmem:[%s3649_s5] sm:$0xff]  ;;  %v1845_v0 = vld [vmem:[%s3649_s5 + $0x28] sm:$0xff] }
 0x70b   :  { %2709 = vmatprep.subr.bf16.mxu0 %v2708_v2  ;;  %v1844_v25 = vld [vmem:[%s3649_s5 + $0x20] sm:$0xff] }
 0x70c   :  { %2711 = vmatpush3.bf16.msra.mxu0 %v2708_v2 }
 0x70d   :  { %v2829_v4 = vpop.permute.xlu0 %2828 }
 0x70e   :  { %v2831_v8 = vunpack.i.h.bf16 %v2829_v4  ;;  %v2830_v10 = vunpack.i.l.bf16 %v2829_v4 }
 0x711   :  { %v2834_v7 = vpop.permute.xlu0 %2833 }
 0x712   :  { %v2836_v28 = vunpack.i.h.bf16 %v2834_v7  ;;  %v2835_v47 = vunpack.i.l.bf16 %v2834_v7 }
 0x714   :  { %v1405_v13 = vsel %vm135_vm0, %v2830_v10, %v2835_v47  ;;  %v1406_v53 = vsel %vm135_vm0, %v2831_v8, %v2836_v28  ;;  %v1746_v47 = vld [vmem:[%s3647_s25] sm:$0xff] }
 0x715   :  { %v2712_v12 = vpack.c.bf16 %v1406_v53, %v1405_v13  ;;  %v1747_v13 = vld [vmem:[%s3647_s25 + $0x8] sm:$0xff]  ;;  %v1748_v53 = vld [vmem:[%s3647_s25 + $0x10] sm:$0xff] }
 0x716   :  { %v2736_v59 = vpack.c.bf16 %v1749_v49, %v1748_v53 }
 0x717   :  { %2713 = vmatprep.subr.bf16.mxu0 %v2712_v12 }
 0x718   :  { %2715 = vmatpush3.bf16.msra.mxu0 %v2712_v12  ;;  %v2732_v12 = vpack.c.bf16 %v1747_v13, %v1746_v47 }
 0x719   :  { %2725 = vmatprep.subr.bf16.mxu0 %v2724_v1 }
 0x71a   :  { %2733 = vmatprep.subr.bf16.mxu1 %v2732_v12 }
 0x71b   :  { %2585 = vmatmul.mubr.msk.f32.vlgmr.msra.gmra.mrb[20].mxu0 %vm1009_vm10, %v3434_v40  ;;  %v1582_v40 = vld [vmem:[%s2995_s21] sm:$0xff]  ;;  %s3646_s21 = sld [smem:[#allocation6_spill]] }
 0x71c   :  { %2727 = vmatpush3.bf16.msra.mxu0 %v2724_v1  ;;  %v2748_v1 = vpack.c.bf16 %v1845_v0, %v1844_v25 }
 0x71d   :  { %2729 = vmatprep.subr.bf16.mxu0 %v2728_v5 }
 0x720   :  { %2731 = vmatpush3.bf16.msra.mxu0 %v2728_v5 }
 0x721   :  { %v2329_v46 = vld [vmem:[%s3646_s21] ss:$0 sm:$0xff] }
 0x7ee   :  { %v2586_v21 = vpop.f32.mrb[20].mxu0 }
 0x7ef   :  { %v1473_v22 = vpop.f32.mrb[21].mxu0 }
 0x7f0   :  { %1488 = vrot.lane.b32.xlu0 %v1473_v22, %s2962_s0 }
 0x7f4   :  { %1490 = vrot.lane.b32.xlu0 %v2586_v21, %s2962_s0 }
 0x7f8   :  { %1586 = vperm.xlu0 %2800, %v1582_v40  }
 0x862   :  { %v1489_v37 = vpop.permute.xlu0 %1488 }
 0x863   :  { %2595 = vmatprep.mubr.msk.f32.mxu1 %vm135_vm0, %v1489_v37  ;;  %v1843_v37 = vld [vmem:[%s3649_s5 + $0x18] sm:$0xff] }
 0x866   :  { %v1491_v23 = vpop.permute.xlu0 %1490 }
 0x867   :  { %2596 = vmatmul.mubr.msk.f32.vlgmr.msra.gmra.mrb[20].mxu1 %vm135_vm0, %v1491_v23 }
 0x868   :  { %2735 = vmatpush3.bf16.msra.mxu1 %v2732_v12 }
 0x869   :  { %2737 = vmatprep.subr.bf16.mxu1 %v2736_v59 }
 0x86c   :  { %2739 = vmatpush3.bf16.msra.mxu1 %v2736_v59  ;;  %v2093_v59 = vld [vmem:[%s2980_s9 + $0x10] sm:$0xff] }
 0x86d   :  { %2757 = vmatprep.subr.bf16.mxu1 %v2756_v20 }
 0x877   :  { %v1587_v39 = vpop.permute.xlu0 %1586 }
 0x93a   :  { %v2597_v6 = vpop.f32.mrb[20].mxu1 }
 0x93b   :  { %v1572_v15 = vadd.f32 %v2597_v6, %v2586_v21  ;;  %v1562_v29 = vpop.f32.mrb[21].mxu1  ;;  %v1841_v21 = vld [vmem:[%s3649_s5 + $0x8] sm:$0xff] }
 0x93c   :  { %v1571_v36 = vadd.f32 %v1562_v29, %v1473_v22  ;;  %v1842_v22 = vld [vmem:[%s3649_s5 + $0x10] sm:$0xff]  ;;  %v2740_v40 = vpack.c.bf16 %v1841_v21, %v1840_v3 }
 0x93d   :  { %v1595_v43 = vmul.f32 %v1592_v30, %v1572_v15  ;;  %v1581_v58 = vmul.f32 %v2327_v41, %v1572_v15  ;;  %v2744_v23 = vpack.c.bf16 %v1843_v37, %v1842_v22 }
 0x93e   :  { %v1594_v44 = vmul.f32 %v1587_v39, %v1571_v36  ;;  %v1580_v50 = vmul.f32 %v2327_v41, %v1571_v36  ;;  %2741 = vmatprep.subr.bf16.mxu0 %v2740_v40  ;;  %v2333_v39 = vld [vmem:[%s3651_s8] ss:$0 sm:$0xff] }
 0x93f   :  { %v1604_v45 = vmul.f32 %v2328_v35, %v1595_v43 }
 0x940   :  { %v1603_v31 = vmul.f32 %v2328_v35, %v1594_v44  ;;  %v2332_v35 = vld [vmem:[%s3650_s3] ss:$0 sm:$0xff] }
 0x941   :  { %v1606_v51 = vadd.f32 %v1604_v45, %v1581_v58 }
 0x942   :  { %v1605_v33 = vadd.f32 %v1603_v31, %v1580_v50  ;;  %v1987_v50 = vld [vmem:[%s3648_s29 + $0x10] sm:$0xff]  ;;  %v1988_v31 = vld [vmem:[%s3648_s29 + $0x18] sm:$0xff] }
 0x944   :  { %2606 = vmatprep.mubr.msk.f32.mxu0 %vm135_vm0, %v1605_v33 }
 0x945   :  { %2607 = vmatmul.mubr.msk.f32.vlgmr.msra.gmra.mrb[22].mxu0 %vm135_vm0, %v1606_v51  ;;  %v2760_v51 = vpack.c.bf16 %v1988_v31, %v1987_v50  ;;  %v2095_v31 = vld [vmem:[%s2980_s9 + $0x20] sm:$0xff] }
 0x946   :  { %2743 = vmatpush3.bf16.msra.mxu0 %v2740_v40 }
 0x947   :  { %2745 = vmatprep.subr.bf16.mxu0 %v2744_v23 }
 0x94a   :  { %2747 = vmatpush3.bf16.msra.mxu0 %v2744_v23 }
 0x94b   :  { %2749 = vmatprep.subr.bf16.mxu0 %v2748_v1 }
 0x94e   :  { %2751 = vmatpush3.bf16.msra.mxu0 %v2748_v1 }
 0xa18   :  { %v2608_v38 = vpop.f32.mrb[22].mxu0 }
 0xa19   :  { %v1696_v60 = vadd.f32 %v2608_v38, %v2329_v46  ;;  %v1690_v42 = vpop.f32.mrb[23].mxu0 }
 0xa1a   :  { %v1691_v63 = vadd.f32 %v2329_v46, %v1690_v42  ;;  %v1846_v46 = vld [vmem:[%s3649_s5 + $0x30] sm:$0xff] }
 0xa1b   :  { %v1700_v55 = vadd.f32 %v2905_v54, %v1696_v60 }
 0xa1c   :  { %v1699_v52 = vadd.f32 %v2906_v17, %v1691_v63 }
 0xa1d   :  { %v1706_v56 = vsel %vm135_vm0, %v1700_v55, 0.0 }
 0xa1e   :  { %1707 = vadd.xlane.f32.xlu1 %v1706_v56  ;;  %v1703_v19 = vsel %vm135_vm0, %v1699_v52, 0.0 }
 0xa1f   :  { %1704 = vadd.xlane.f32.xlu0 %v1703_v19  ;;  %v2091_v19 = vld [vmem:[%s2980_s9] sm:$0xff] }
 0xaab   :  { %v1708_v61 = vpop.xlane.xlu1 %1707 }
 0xaac   :  { %v1711_v34 = vmul.f32 0.03125, %v1708_v61  ;;  %v1705_v48 = vpop.xlane.xlu0 %1704 }
 0xaad   :  { %v1710_v62 = vmul.f32 0.03125, %v1705_v48 }
 0xaae   :  { %v1713_v2 = vsub.f32 %v1700_v55, %v1711_v34  ;;  %v2092_v55 = vld [vmem:[%s2980_s9 + $0x8] sm:$0xff] }
 0xaaf   :  { %v1712_v4 = vsub.f32 %v1699_v52, %v1710_v62 }
 0xab0   :  { %v1715_v10 = vmul.f32 %v1713_v2, %v1713_v2 }
 0xab1   :  { %v1714_v7 = vmul.f32 %v1712_v4, %v1712_v4 }
 0xab2   :  { %v1719_v28 = vsel %vm135_vm0, %v1715_v10, 0.0  ;;  %v2096_v10 = vld [vmem:[%s2980_s9 + $0x28] sm:$0xff] }
 0xab3   :  { %v1716_v8 = vsel %vm135_vm0, %v1714_v7, 0.0  ;;  %v2094_v7 = vld [vmem:[%s2980_s9 + $0x18] sm:$0xff]  ;;  %s3655_s9 = sld [smem:[#allocation13_spill]] }
 0xab4   :  { %1717 = vadd.xlane.f32.xlu0 %v1716_v8 }
 0xab8   :  { %1720 = vadd.xlane.f32.xlu0 %v1719_v28 }
 0xb41   :  { %v1718_v14 = vpop.xlane.xlu0 %1717 }
 0xb42   :  { %v1722_v27 = vmul.f32 0.03125, %v1718_v14 }
 0xb44   :  { %v1724_v5 = vadd.f32 1e-05, %v1722_v27 }
 0xb45   :  { %v1721_v6 = vpop.xlane.xlu0 %1720 }
 0xb46   :  { %2885 = vrsqrt.f32 %v1724_v5  ;;  %v1723_v15 = vmul.f32 0.03125, %v1721_v6 }
 0xb48   :  { %v1725_v29 = vadd.f32 1e-05, %v1723_v15  ;;  %v2337_v15 = vld [vmem:[%s3654_s24] ss:$0 sm:$0xff] }
 0xb4a   :  { %2887 = vrsqrt.f32 %v1725_v29 }
 0xb50   :  { %v2886_v30 = vpop.eup %2885 }
 0xb51   :  { %v1728_v36 = vmul.f32 %v2886_v30, %v1712_v4 }
 0xb53   :  { %v1736_v41 = vmul.f32 %v2332_v35, %v1728_v36 }
 0xb54   :  { %v2888_v43 = vpop.eup %2887 }
 0xb55   :  { %v1729_v44 = vmul.f32 %v2888_v43, %v1713_v2  ;;  %v3526_v45 = vadd.f32 %v2333_v39, %v1736_v41 }
 0xb57   :  { %v1737_v58 = vmul.f32 %v2332_v35, %v1729_v44  ;;  %2617 = vmatprep.mubr.msk.f32.mxu1 %vm135_vm0, %v3526_v45 }
 0xb59   :  { %v3532_v33 = vadd.f32 %v2333_v39, %v1737_v58 }
 0xb5b   :  { %2618 = vmatmul.mubr.msk.f32.vlgmr.msra.gmra.mrb[22].mxu1 %vm135_vm0, %v3532_v33 }
 0xb5c   :  { %2759 = vmatpush3.bf16.msra.mxu1 %v2756_v20  ;;  %2647 = vmatprep.mubr.msk.f32.mxu1 %vm135_vm0, %v3385_v24  ;;  %v1847_v24 = vld [vmem:[%s3649_s5 + $0x38] sm:$0xff] }
 0xb5d   :  { %2761 = vmatprep.subr.bf16.mxu1 %v2760_v51  ;;  %v2752_v38 = vpack.c.bf16 %v1847_v24, %v1846_v46 }
 0xb5f   :  { %2753 = vmatprep.subr.bf16.mxu0 %v2752_v38 }
 0xb60   :  { %2763 = vmatpush3.bf16.msra.mxu1 %v2760_v51  ;;  %2755 = vmatpush3.bf16.msra.mxu0 %v2752_v38 }
 0xb63   :  { %2648 = vmatmul.mubr.msk.f32.vlgmr.msra.gmra.mrb[24].mxu1 %vm135_vm0, %v3389_v26  ;;  %v2334_v26 = vld [vmem:[%s3652_s14] ss:$0 sm:$0xff] }
 0xb64   :  { %2650 = vmatprep.mubr.msk.f32.mxu1 %vm135_vm0, %v3396_v57 }
 0xb67   :  { %2651 = vmatmul.mubr.msk.f32.gmra.mrb[26].mxu1 %vm135_vm0, %v3399_v32 }
 0xb68   :  { %2653 = vmatprep.mubr.msk.f32.mxu1 %vm135_vm0, %v3423_v9  ;;  %v2342_v9 = vld [vmem:[%s3653_s19] ss:$0 sm:$0xff] }
 0xb6b   :  { %2654 = vmatmul.mubr.msk.f32.gmra.mrb[28].mxu1 %vm135_vm0, %v3427_v11 }
 0xc2e   :  { %v2619_v60 = vpop.f32.mrb[22].mxu1 }
 0xc2f   :  { %v1835_v57 = vadd.f32 %v2619_v60, %v2334_v26  ;;  %v1829_v42 = vpop.f32.mrb[23].mxu1 }
 0xc30   :  { %v1830_v63 = vadd.f32 %v2334_v26, %v1829_v42 }
 0xc31   :  { %v1839_v54 = vmax.f32 %v1835_v57, 0.0 }
 0xc32   :  { %v1838_v32 = vmax.f32 %v1830_v63, 0.0 }
 0xc34   :  { %2636 = vmatprep.mubr.msk.f32.mxu0 %vm1855_vm12, %v1838_v32 }
 0xc35   :  { %2637 = vmatmul.mubr.msk.f32.vlgmr.msra.gmra.mrb[24].mxu0 %vm1855_vm12, %v1839_v54 }
 0xc36   :  { %v2649_v11 = vpop.f32.mrb[24].mxu1 }
 0xc37   :  { %v2068_v17 = vadd.f32 %v2649_v11, %v2342_v9  ;;  %v2062_v52 = vpop.f32.mrb[25].mxu1 }
 0xc38   :  { %v2063_v56 = vadd.f32 %v2342_v9, %v2062_v52  ;;  %v3585_v52 = vld [vmem:[%s3105_s30] ss:$0 sm:$0xff]  ;;  %s3656_s30 = sld [smem:[#allocation14_spill]] }
 0xc39   :  { %v2098_v61 = vadd.f32 %v2092_v55, %v2068_v17 }
 0xc3a   :  { %v2652_v34 = vpop.f32.mrb[26].mxu1  ;;  %v2097_v4 = vadd.f32 %v2091_v19, %v2063_v56  ;;  %v3588_v19 = vld [vmem:[%s3110_s20] ss:$0 sm:$0xff]  ;;  %s2907_s20 = scalar_lea.vmem %s2219_s12, 256 }
 0xc3b   :  { %v2078_v48 = vadd.f32 %v2652_v34, %v2342_v9  ;;  %v2072_v62 = vpop.f32.mrb[27].mxu1  ;;  %v2108_v2 = vsel %vm135_vm0, %v2098_v61, 0.0  ;;  %p2908_p0 = scmp.ne.s32.totalorder %s2219_s12, %s2907_s20  ;;  %p2913_p2 = scmp.lt.s32.totalorder %s2907_s20, %s2907_s20 }
 0xc3c   :  { %2109 = vadd.xlane.f32.xlu0 %v2108_v2  ;;  %v2073_v28 = vadd.f32 %v2342_v9, %v2072_v62  ;;  %v2105_v53 = vsel %vm135_vm0, %v2097_v4, 0.0 }
 0xc3d   :  { %v2100_v12 = vadd.f32 %v2094_v7, %v2078_v48  ;;  %p2914_p3 = por %p2913_p2, %p2912_p1 }
 0xc3e   :  { %v2655_v8 = vpop.f32.mrb[28].mxu1  ;;  %v2099_v3 = vadd.f32 %v2093_v59, %v2073_v28 }
 0xc3f   :  { %v2088_v47 = vadd.f32 %v2655_v8, %v2342_v9  ;;  %v2082_v13 = vpop.f32.mrb[29].mxu1  ;;  %v2114_v20 = vsel %vm135_vm0, %v2100_v12, 0.0  ;;  %p2915_p4 = pnand %p2914_p3, %p2908_p0 }
 0xc40   :  { %v2083_v49 = vadd.f32 %v2342_v9, %v2082_v13  ;;  %2106 = vadd.xlane.f32.xlu0 %v2105_v53  ;;  %v2111_v21 = vsel %vm135_vm0, %v2099_v3, 0.0 }
 0xc41   :  { %v3559_v16 = vadd.f32 %v2096_v10, %v2088_v47 }
 0xc42   :  { %v2101_v24 = vadd.f32 %v2095_v31, %v2083_v49 }
 0xc43   :  { %v2120_v18 = vsel %vm135_vm0, %v3559_v16, 0.0 }
 0xc44   :  { %2121 = vadd.xlane.f32.xlu1 %v2120_v18  ;;  %2115 = vadd.xlane.f32.xlu0 %v2114_v20  ;;  %v2117_v26 = vsel %vm135_vm0, %v2101_v24, 0.0 }
 0xc48   :  { %2112 = vadd.xlane.f32.xlu0 %v2111_v21 }
 0xcc9   :  { %v2110_v22 = vpop.xlane.xlu0 %2109 }
 0xcca   :  { %v2124_v40 = vmul.f32 0.03125, %v2110_v22 }
 0xccc   :  { %v2130_v37 = vsub.f32 %v2098_v61, %v2124_v40 }
 0xccd   :  { %v2107_v23 = vpop.xlane.xlu0 %2106 }
 0xcce   :  { %v2136_v25 = vmul.f32 %v2130_v37, %v2130_v37  ;;  %v2123_v41 = vmul.f32 0.03125, %v2107_v23 }
 0xcd0   :  { %v2144_v0 = vsel %vm135_vm0, %v2136_v25, 0.0  ;;  %v3572_v58 = vsub.f32 %v2097_v4, %v2123_v41 }
 0xcd1   :  { %2145 = vadd.xlane.f32.xlu1 %v2144_v0  ;;  %v2116_v1 = vpop.xlane.xlu0 %2115  ;;  %v2122_v42 = vpop.xlane.xlu1 %2121 }
 0xcd2   :  { %v2126_v14 = vmul.f32 0.03125, %v2116_v1  ;;  %v2128_v7 = vmul.f32 0.03125, %v2122_v42 }
 0xcd4   :  { %v2132_v27 = vsub.f32 %v2100_v12, %v2126_v14  ;;  %v2134_v28 = vsub.f32 %v3559_v16, %v2128_v7 }
 0xcd5   :  { %v2113_v50 = vpop.xlane.xlu0 %2112 }
 0xcd6   :  { %v2138_v5 = vmul.f32 %v2132_v27, %v2132_v27  ;;  %v2125_v51 = vmul.f32 0.03125, %v2113_v50  ;;  %v2140_v18 = vmul.f32 %v2134_v28, %v2134_v28 }
 0xcd8   :  { %v2150_v6 = vsel %vm135_vm0, %v2138_v5, 0.0  ;;  %v3575_v38 = vsub.f32 %v2099_v3, %v2125_v51  ;;  %v2156_v40 = vsel %vm135_vm0, %v2140_v18, 0.0 }
 0xcd9   :  { %2151 = vadd.xlane.f32.xlu1 %v2150_v6 }
 0xcda   :  { %v2137_v60 = vmul.f32 %v3575_v38, %v3575_v38 }
 0xcdc   :  { %v2147_v57 = vsel %vm135_vm0, %v2137_v60, 0.0 }
 0xd08   :  { %v2638_v29 = vpop.f32.mrb[24].mxu0 }
 0xd09   :  { %v1934_v30 = vadd.f32 %v2638_v29, %v2337_v15  ;;  %v1928_v35 = vpop.f32.mrb[25].mxu0 }
 0xd0a   :  { %v1929_v36 = vadd.f32 %v2337_v15, %v1928_v35 }
 0xd0b   :  { %v1938_v39 = vadd.f32 %v1934_v30, %v3532_v33  ;;  %v2135_v33 = vmul.f32 %v3572_v58, %v3572_v58 }
 0xd0c   :  { %v1937_v44 = vadd.f32 %v1929_v36, %v3526_v45 }
 0xd0d   :  { %v1944_v43 = vsel %vm135_vm0, %v1938_v39, 0.0  ;;  %v2141_v45 = vsel %vm135_vm0, %v2135_v33, 0.0 }
 0xd0e   :  { %1945 = vadd.xlane.f32.xlu0 %v1944_v43  ;;  %v1941_v46 = vsel %vm135_vm0, %v1937_v44, 0.0 }
 0xd12   :  { %1942 = vadd.xlane.f32.xlu0 %v1941_v46 }
 0xd16   :  { %2118 = vadd.xlane.f32.xlu0 %v2117_v26 }
 0xd1a   :  { %2142 = vadd.xlane.f32.xlu0 %v2141_v45 }
 0xd1e   :  { %2148 = vadd.xlane.f32.xlu0 %v2147_v57  ;;  %v2340_v57 = vld [vmem:[%s3655_s9] ss:$0 sm:$0xff] }
 0xd5e   :  { %v2146_v63 = vpop.xlane.xlu1 %2145 }
 0xd5f   :  { %v2160_v32 = vmul.f32 0.03125, %v2146_v63  ;;  %v2341_v63 = vld [vmem:[%s3656_s30] ss:$0 sm:$0xff] }
 0xd61   :  { %v2166_v54 = vadd.f32 1e-05, %v2160_v32 }
 0xd63   :  { %2889 = vrsqrt.f32 %v2166_v54 }
 0xd66   :  { %v2152_v9 = vpop.xlane.xlu1 %2151 }
 0xd67   :  { %v2162_v11 = vmul.f32 0.03125, %v2152_v9 }
 0xd69   :  { %v2168_v55 = vadd.f32 1e-05, %v2162_v11 }
 0xd6b   :  { %2891 = vrsqrt.f32 %v2168_v55 }
 0xd6d   :  { %v2890_v17 = vpop.eup %2889 }
 0xd6e   :  { %v2178_v56 = vmul.f32 %v2890_v17, %v2130_v37 }
 0xd70   :  { %v2190_v61 = vmul.f32 %v3585_v52, %v2178_v56 }
 0xd72   :  { %v2202_v34 = vadd.f32 %v3588_v19, %v2190_v61 }
 0xd74   :  { %2208 = vst.msk [vmem:[%s3120_s4 + $0x8] sm:$0xff] %vm135_vm0, %v2202_v34 }
 0xd75   :  { %v2892_v48 = vpop.eup %2891 }
 0xd76   :  { %v2180_v62 = vmul.f32 %v2892_v48, %v2132_v27 }
 0xd78   :  { %v2192_v2 = vmul.f32 %v3585_v52, %v2180_v62 }
 0xd7a   :  { %v2204_v4 = vadd.f32 %v3588_v19, %v2192_v2 }
 0xd7c   :  { %2210 = vst.msk [vmem:[%s3120_s4 + $0x18] sm:$0xff] %vm135_vm0, %v2204_v4 }
 0xd9b   :  { %v1946_v8 = vpop.xlane.xlu0 %1945 }
 0xd9c   :  { %v1948_v10 = vmul.f32 0.03125, %v1946_v8 }
 0xd9e   :  { %v1950_v47 = vsub.f32 %v1938_v39, %v1948_v10 }
 0xd9f   :  { %v1943_v13 = vpop.xlane.xlu0 %1942 }
 0xda0   :  { %v1947_v53 = vmul.f32 0.03125, %v1943_v13  ;;  %v1952_v12 = vmul.f32 %v1950_v47, %v1950_v47 }
 0xda2   :  { %v1949_v49 = vsub.f32 %v1937_v44, %v1947_v53  ;;  %v1956_v59 = vsel %vm135_vm0, %v1952_v12, 0.0 }
 0xda3   :  { %1957 = vadd.xlane.f32.xlu1 %v1956_v59  ;;  %v2119_v20 = vpop.xlane.xlu0 %2118 }
 0xda4   :  { %v2127_v3 = vmul.f32 0.03125, %v2119_v20  ;;  %v1951_v21 = vmul.f32 %v1949_v49, %v1949_v49 }
 0xda6   :  { %v2133_v22 = vsub.f32 %v2101_v24, %v2127_v3  ;;  %v1953_v37 = vsel %vm135_vm0, %v1951_v21, 0.0 }
 0xda7   :  { %2157 = vadd.xlane.f32.xlu1 %v2156_v40  ;;  %1954 = vadd.xlane.f32.xlu0 %v1953_v37  ;;  %v2143_v16 = vpop.xlane.xlu0 %2142 }
 0xda8   :  { %v2159_v23 = vmul.f32 0.03125, %v2143_v16  ;;  %v2139_v25 = vmul.f32 %v2133_v22, %v2133_v22 }
 0xdaa   :  { %v2165_v0 = vadd.f32 1e-05, %v2159_v23  ;;  %v2153_v1 = vsel %vm135_vm0, %v2139_v25, 0.0 }
 0xdab   :  { %2154 = vadd.xlane.f32.xlu0 %v2153_v1  ;;  %v2149_v14 = vpop.xlane.xlu0 %2148 }
 0xdac   :  { %2893 = vrsqrt.f32 %v2165_v0  ;;  %v2161_v27 = vmul.f32 0.03125, %v2149_v14 }
 0xdae   :  { %v2167_v5 = vadd.f32 1e-05, %v2161_v27 }
 0xdb0   :  { %2895 = vrsqrt.f32 %v2167_v5 }
 0xdb6   :  { %v2894_v6 = vpop.eup %2893 }
 0xdb7   :  { %v2177_v15 = vmul.f32 %v2894_v6, %v3572_v58 }
 0xdb9   :  { %v2189_v29 = vmul.f32 %v3585_v52, %v2177_v15 }
 0xdba   :  { %v2896_v30 = vpop.eup %2895 }
 0xdbb   :  { %v2201_v35 = vadd.f32 %v3588_v19, %v2189_v29  ;;  %v2179_v36 = vmul.f32 %v2896_v30, %v3575_v38 }
 0xdbd   :  { %2207 = vst.msk [vmem:[%s3120_s4] sm:$0xff] %vm135_vm0, %v2201_v35  ;;  %v2191_v39 = vmul.f32 %v3585_v52, %v2179_v36 }
 0xdbf   :  { %v2203_v41 = vadd.f32 %v3588_v19, %v2191_v39 }
 0xdc1   :  { %2209 = vst.msk [vmem:[%s3120_s4 + $0x10] sm:$0xff] %vm135_vm0, %v2203_v41 }
 0xe30   :  { %v1958_v43 = vpop.xlane.xlu1 %1957 }
 0xe31   :  { %v1960_v44 = vmul.f32 0.03125, %v1958_v43 }
 0xe33   :  { %v1962_v50 = vadd.f32 1e-05, %v1960_v44 }
 0xe34   :  { %v2158_v31 = vpop.xlane.xlu1 %2157  ;;  %v1955_v58 = vpop.xlane.xlu0 %1954 }
 0xe35   :  { %2897 = vrsqrt.f32 %v1962_v50  ;;  %v2164_v51 = vmul.f32 0.03125, %v2158_v31  ;;  %v1959_v46 = vmul.f32 0.03125, %v1955_v58 }
 0xe37   :  { %v2170_v24 = vadd.f32 1e-05, %v2164_v51  ;;  %v1961_v38 = vadd.f32 1e-05, %v1959_v46 }
 0xe38   :  { %v2155_v26 = vpop.xlane.xlu0 %2154 }
 0xe39   :  { %2899 = vrsqrt.f32 %v2170_v24  ;;  %v2163_v33 = vmul.f32 0.03125, %v2155_v26 }
 0xe3a   :  { %2901 = vrsqrt.f32 %v1961_v38 }
 0xe3b   :  { %v2169_v45 = vadd.f32 1e-05, %v2163_v33 }
 0xe3d   :  { %2903 = vrsqrt.f32 %v2169_v45 }
 0xe3f   :  { %v2898_v60 = vpop.eup %2897 }
 0xe40   :  { %v1966_v42 = vmul.f32 %v2898_v60, %v1950_v47 }
 0xe42   :  { %v1974_v32 = vmul.f32 %v2340_v57, %v1966_v42 }
 0xe43   :  { %v2900_v54 = vpop.eup %2899 }
 0xe44   :  { %v2902_v9 = vpop.eup %2901  ;;  %v2182_v11 = vmul.f32 %v2900_v54, %v2134_v28  ;;  %v1982_v55 = vadd.f32 %v2341_v63, %v1974_v32 }
 0xe45   :  { %v1965_v17 = vmul.f32 %v2902_v9, %v1949_v49 }
 0xe46   :  { %v2194_v56 = vmul.f32 %v3585_v52, %v2182_v11  ;;  %1984 = vst.msk [vmem:[#allocation2 + $0x8] sm:$0xff] %vm135_vm0, %v1982_v55 }
 0xe47   :  { %v2904_v61 = vpop.eup %2903  ;;  %v1973_v34 = vmul.f32 %v2340_v57, %v1965_v17 }
 0xe48   :  { %v2206_v48 = vadd.f32 %v3588_v19, %v2194_v56  ;;  %v2181_v62 = vmul.f32 %v2904_v61, %v2133_v22 }
 0xe49   :  { %v1981_v2 = vadd.f32 %v2341_v63, %v1973_v34 }
 0xe4a   :  { %2212 = vst.msk [vmem:[%s3120_s4 + $0x28] sm:$0xff] %vm135_vm0, %v2206_v48  ;;  %v2193_v4 = vmul.f32 %v3585_v52, %v2181_v62 }
 0xe4b   :  { %1983 = vst.msk [vmem:[#allocation2] sm:$0xff] %vm135_vm0, %v1981_v2 }
 0xe4c   :  { %v2205_v7 = vadd.f32 %v3588_v19, %v2193_v4 }
 0xe4d   :  { %2918 = shalt.err (!%p2915_p4)
}
 0xe4e   :  { %s2919_s7 = scalar_lea.hbm %s3115_s27, 256 }
 0xe4f   :  { %p2920_p5 = scmp.ne.s32.totalorder %s3115_s27, %s2919_s7  ;;  %p2923_p6 = scmp.lt.u32.totalorder %s2919_s7, %s3115_s27 }
 0xe51   :  { %p2925_p7 = pnand %p2923_p6, %p2920_p5 }
 0xe53   :  { %2928 = shalt.err (!%p2925_p7)
}
 0xe54   :  { %s2965_s10 = smov 128   ;;  %s2966_s11 = smov 8   ;;  %2211 = vst.msk [vmem:[%s3120_s4 + $0x20] sm:$0xff] %vm135_vm0, %v2205_v7 }
 0xe55   :  { %2224 = dma.vmem_to_hbm [thread:$0]  %s2219_s12, 256, %s3115_s27, [#allocation3], %s2965_s10, %s2965_s10, %s2966_s11  }
 0xe56   :  { %2929 = dma.done.wait [#allocation3], 256  }
 0xe57   :  { %2930 = vsyncadd [#allocation3], 4294967040 }
 0xe58   :  { %2232 = vsyncpa [#allocation3], 1 }

</bundles_post_ra>
